<compile_context>
chip_gen: v7x
topology: tpu7x:2x2x1
jax: 0.10.0
libtpu: 0.0.40
codegen_flags: <defaults>
</compile_context>

<pallas_src>
import functools

import jax
import jax.numpy as jnp
from jax import lax
from jax.experimental import pallas as pl
from jax.experimental.pallas import tpu as pltpu


def _pick_pixel_tile(hw, cap=1024):
    """Largest divisor of hw that is a multiple of 8 and <= cap."""
    best = 0
    t = 8
    while t <= min(hw, cap):
        if hw % t == 0:
            best = t
        t += 8
    assert best > 0, "H*W must be a multiple of 8 for this kernel"
    return best


def aan_fused_kernel(x_ref, w1_ref, w2_ref, wfc_hbm, bfc_ref, out_ref,
                     acc_ref, wfc_vmem, wfc_sem, *, hw):
    # x_ref   : (TP, C)        channels-last pixel tile, bf16 (C on lanes)
    # w1_ref  : (C, K*Cmid)    three conv1x1_1 weights stacked, bf16
    # w2_ref  : (K*Cmid, K)    block-diagonal conv1x1_2 weights, bf16
    # wfc_hbm : (K*C, Dout)    fc weight left in HBM (manual DMA), bf16
    # bfc_ref : (1, Dout)      fc bias, f32
    # out_ref : (N, Dout)      f32
    # acc_ref : (N, K, C)      f32 pooled-feature accumulator (scratch)
    # wfc_vmem: (K*C, Dout)    bf16 VMEM landing buffer for the fc weight
    n = pl.program_id(0)               # batch element
    j = pl.program_id(1)               # pixel tile within this batch element
    last_n = pl.num_programs(0) - 1
    last_j = pl.num_programs(1) - 1
    k_iter = w2_ref.shape[1]

    # Kick off the fc-weight DMA at the very first grid step so its transfer
    # hides behind the attention / pooling compute of the whole grid.
    @pl.when((n == 0) & (j == 0))
    def _():
        pltpu.make_async_copy(wfc_hbm, wfc_vmem, wfc_sem).start()

    x_t = x_ref[...]                                                  # (TP, C) bf16

    # conv1x1_1 for all K weight re-inits in one MXU matmul, then ReLU.
    hidden = jnp.maximum(
        jnp.dot(x_t, w1_ref[...], preferred_element_type=jnp.float32), 0.0)

    # conv1x1_2 (out_channels=1) for all K iterations via the block-diagonal
    # weight, then sigmoid -> one attention column per iteration.
    att = jax.nn.sigmoid(
        jnp.dot(hidden.astype(jnp.bfloat16), w2_ref[...],
                preferred_element_type=jnp.float32))                  # (TP, K) f32

    # TODO(synk): AE random erasing uses python `random`; only the deterministic
    # identity branch (mask == ones) is implemented.

    # adaptive_avg_pool2d(x * map_k, (1,1)) == (sum_p att[p,k] * x[p,:]) / HW.
    # Contract the pixel axis directly on the MXU (no transpose, no per-n loop).
    pooled_part = lax.dot_general(
        att.astype(jnp.bfloat16), x_t,
        dimension_numbers=(((0,), (0,)), ((), ())),
        preferred_element_type=jnp.float32)                           # (K, C) f32

    @pl.when(j == 0)
    def _():
        acc_ref[n] = jnp.zeros_like(pooled_part)

    acc_ref[n] = acc_ref[n] + pooled_part

    # Finalize: fc(concat_k pooled_k) + bias as ONE (N, K*C) @ (K*C, Dout)
    # matmul, single lane-dense store of the (N, Dout) result.
    @pl.when((n == last_n) & (j == last_j))
    def _():
        pltpu.make_async_copy(wfc_hbm, wfc_vmem, wfc_sem).wait()
        inv_hw = 1.0 / hw
        # Lane-aligned concat (each piece is exactly C=128 lanes wide), matching
        # torch.cat(res, dim=-1) ordering.
        feat = jnp.concatenate(
            [acc_ref[:, k, :] for k in range(k_iter)], axis=-1) * inv_hw
        out = jnp.dot(feat.astype(jnp.bfloat16), wfc_vmem[...],
                      preferred_element_type=jnp.float32) + bfc_ref[...]
        out_ref[...] = out.astype(out_ref.dtype)


def aan_forward(x_nchw, w1_stack, w2_stack, wfc, bfc):
    N, C, H, W = x_nchw.shape
    HW = H * W
    K, _, Cmid = w1_stack.shape
    Din, Dout = wfc.shape
    assert Din == K * C

    # NCHW -> channels-last pixels (N*HW, C); bf16 operands for the MXU.
    # TODO(synk): accept channels-last activations upstream and drop this transpose.
    x = jnp.transpose(x_nchw, (0, 2, 3, 1)).reshape(N * HW, C).astype(jnp.bfloat16)

    # Stack conv1 weights side by side; block-diagonalize conv2 weights.
    w1_cat = jnp.transpose(w1_stack, (1, 0, 2)).reshape(C, K * Cmid).astype(jnp.bfloat16)
    w2_bd = jax.scipy.linalg.block_diag(
        *[w2_stack[k] for k in range(K)]).astype(jnp.bfloat16)        # (K*Cmid, K)
    wfc_b = wfc.astype(jnp.bfloat16)                                  # (K*C, Dout)
    bfc_f = bfc.astype(jnp.float32).reshape(1, Dout)

    TP = _pick_pixel_tile(HW)          # pixel-tile rows (divides HW, multiple of 8)
    T = HW // TP

    kernel = functools.partial(aan_fused_kernel, hw=HW)

    flops = 2 * N * HW * (C * K * Cmid + K * Cmid * K + K * C) + 2 * N * K * C * Dout
    bytes_accessed = (x.size * 2 + w1_cat.size * 2 + w2_bd.size * 2
                      + wfc_b.size * 2 + bfc_f.size * 4 + N * Dout * 4)

    return pl.pallas_call(
        kernel,
        out_shape=jax.ShapeDtypeStruct((N, Dout), jnp.float32),
        grid=(N, T),
        in_specs=[
            pl.BlockSpec((TP, C), lambda n, j: (n * T + j, 0)),       # x pixel tiles
            pl.BlockSpec((C, K * Cmid), lambda n, j: (0, 0)),         # w1 (resident)
            pl.BlockSpec((K * Cmid, K), lambda n, j: (0, 0)),         # w2 (resident)
            pl.BlockSpec(memory_space=pl.ANY),                        # wfc: manual DMA
            pl.BlockSpec((1, Dout), lambda n, j: (0, 0)),             # bias
        ],
        out_specs=pl.BlockSpec((N, Dout), lambda n, j: (0, 0)),
        scratch_shapes=[
            pltpu.VMEM((N, K, C), jnp.float32),        # pooled-feature accumulator
            pltpu.VMEM((Din, Dout), jnp.bfloat16),     # fc-weight landing buffer
            pltpu.SemaphoreType.DMA,                   # fc-weight DMA semaphore
        ],
        compiler_params=pltpu.CompilerParams(
            # Accumulator + single final store span the whole grid, so both axes
            # are reductions from Pallas' point of view.
            # TODO(synk): on v7x, shard the batch axis across the 2 TensorCores
            # with per-core partial accumulators combined at the end.
            dimension_semantics=("arbitrary", "arbitrary")),
        cost_estimate=pl.CostEstimate(
            flops=flops,
            transcendentals=N * HW * K,
            bytes_accessed=bytes_accessed),
    )(x, w1_cat, w2_bd, wfc_b, bfc_f)


def aan_reference(x_nchw, w1_stack, w2_stack, wfc, bfc):
    # Pure-JAX f32 reference (identity AE branch).
    N, C, H, W = x_nchw.shape
    x = jnp.transpose(x_nchw, (0, 2, 3, 1)).reshape(N, H * W, C).astype(jnp.float32)
    feats = []
    for k in range(w1_stack.shape[0]):
        h = jnp.maximum(jnp.einsum('nsc,cm->nsm', x, w1_stack[k].astype(jnp.float32),
                                   precision='highest'), 0.0)
        logit = jnp.einsum('nsm,mo->nso', h, w2_stack[k].astype(jnp.float32),
                           precision='highest')
        att = jax.nn.sigmoid(logit)                        # (N, HW, 1)
        feats.append(jnp.mean(x * att, axis=1))            # (N, C)
    feat = jnp.concatenate(feats, axis=-1)                 # (N, 3C)
    return jnp.dot(feat, wfc.astype(jnp.float32), precision='highest') + bfc


if __name__ == "__main__":
    # fc is Linear(384, 512) and the feature is 3*C  =>  C must be 128.
    N, C, H, W = 2, 128, 8, 8
    reduction = 16
    Cmid = C // reduction
    K = 3
    Din, Dout = K * C, 512              # 384 -> 512

    key = jax.random.PRNGKey(0)
    k_x, k_w1, k_w2, k_fcw, k_fcb = jax.random.split(key, 5)

    x = jax.random.normal(k_x, (N, C, H, W), dtype=jnp.float32)

    # Three independent "kaiming" re-inits of the (bias-free) 1x1 convs.
    w1_stack = jax.random.normal(k_w1, (K, C, Cmid), dtype=jnp.float32) * jnp.sqrt(2.0 / C)
    w2_stack = jax.random.normal(k_w2, (K, Cmid, 1), dtype=jnp.float32) * jnp.sqrt(2.0 / Cmid)

    # PyTorch Linear default init: U(-1/sqrt(fan_in), 1/sqrt(fan_in)).
    bound = 1.0 / jnp.sqrt(jnp.float32(Din))
    wfc = jax.random.uniform(k_fcw, (Din, Dout), minval=-bound, maxval=bound,
                             dtype=jnp.float32)
    bfc = jax.random.uniform(k_fcb, (1, Dout), minval=-bound, maxval=bound,
                             dtype=jnp.float32)

    out = jax.jit(aan_forward)(x, w1_stack, w2_stack, wfc, bfc)
    out = jax.block_until_ready(out)
    assert out.shape == (N, Dout), out.shape

    # Reference computed in f32 from the same bf16-rounded operands the kernel
    # consumes, so the comparison isolates kernel-internal numerics.
    bf = lambda a: a.astype(jnp.bfloat16).astype(jnp.float32)
    ref = aan_reference(bf(x), bf(w1_stack), bf(w2_stack), bf(wfc), bfc)
    max_err = float(jnp.max(jnp.abs(out - ref)))
    assert jnp.allclose(out, ref, rtol=2e-2, atol=2e-2), max_err

    print("KERNEL_OK")
</pallas_src>

<mosaic_0001>
module attributes {stable_mosaic.version = 11 : i64} {
  func.func @aan_fused_kernel(%arg0: i32, %arg1: i32, %arg2: memref<64x128xbf16, #tpu.memory_space<vmem>>, %arg3: memref<128x24xbf16, #tpu.memory_space<vmem>>, %arg4: memref<24x3xbf16, #tpu.memory_space<vmem>>, %arg5: memref<384x512xbf16, #tpu.memory_space<any>>, %arg6: memref<1x512xf32, #tpu.memory_space<vmem>>, %arg7: memref<2x512xf32, #tpu.memory_space<vmem>>, %arg8: memref<2x3x128xf32, #tpu.memory_space<vmem>>, %arg9: memref<384x512xbf16, #tpu.memory_space<vmem>>, %arg10: memref<!tpu.dma_semaphore, #tpu.memory_space<semaphore_mem>>) attributes {dimension_semantics = [#tpu.dimension_semantics<arbitrary>, #tpu.dimension_semantics<arbitrary>], iteration_bounds = array<i64: 2, 1>, scalar_prefetch = 0 : i64, scratch_operands = 3 : i64, tpu.core_type = #tpu.core_type<tc>, window_params = [{transform_indices = @transform_0, window_bounds = array<i64: 64, 128>}, {pipeline_mode = #tpu.pipeline_mode<synchronous>, transform_indices = @transform_1, window_bounds = array<i64: 128, 24>}, {pipeline_mode = #tpu.pipeline_mode<synchronous>, transform_indices = @transform_2, window_bounds = array<i64: 24, 3>}, {}, {pipeline_mode = #tpu.pipeline_mode<synchronous>, transform_indices = @transform_4, window_bounds = array<i64: 1, 512>}, {pipeline_mode = #tpu.pipeline_mode<synchronous>, transform_indices = @transform_5, window_bounds = array<i64: 2, 512>}]} {
    %c0_i32 = arith.constant 0 : i32
    %0 = arith.cmpi eq, %arg0, %c0_i32 : i32
    %c0_i32_0 = arith.constant 0 : i32
    %1 = arith.cmpi eq, %arg1, %c0_i32_0 : i32
    %2 = arith.andi %0, %1 : i1
    %3 = arith.extui %2 : i1 to i32
    %c0_i32_1 = arith.constant 0 : i32
    %4 = arith.cmpi ne, %3, %c0_i32_1 : i32
    scf.if %4 {
      tpu.enqueue_dma source(%arg5 : memref<384x512xbf16, #tpu.memory_space<any>>) target(%arg9 : memref<384x512xbf16, #tpu.memory_space<vmem>>) target_semaphore(%arg10 : memref<!tpu.dma_semaphore, #tpu.memory_space<semaphore_mem>>)
    } else {
    }
    %c0 = arith.constant 0 : index
    %c0_2 = arith.constant 0 : index
    %5 = vector.load %arg2[%c0, %c0_2] : memref<64x128xbf16, #tpu.memory_space<vmem>>, vector<64x128xbf16>
    %c0_3 = arith.constant 0 : index
    %c0_4 = arith.constant 0 : index
    %6 = vector.load %arg3[%c0_3, %c0_4] : memref<128x24xbf16, #tpu.memory_space<vmem>>, vector<128x24xbf16>
    %cst = arith.constant dense<0.000000e+00> : vector<64x24xf32>
    %7 = tpu.matmul %5, %6, %cst {dimension_numbers = #tpu.dot_dimension_numbers<[1], [0], [0], [1], [0, 0, 1, 1], [], []>} : vector<64x128xbf16>, vector<128x24xbf16>, vector<64x24xf32> -> vector<64x24xf32>
    %cst_5 = arith.constant 0.000000e+00 : f32
    %8 = vector.broadcast %cst_5 : f32 to vector<64x24xf32>
    %9 = arith.maximumf %7, %8 : vector<64x24xf32>
    %10 = arith.truncf %9 : vector<64x24xf32> to vector<64x24xbf16>
    %c0_6 = arith.constant 0 : index
    %c0_7 = arith.constant 0 : index
    %11 = vector.load %arg4[%c0_6, %c0_7] : memref<24x3xbf16, #tpu.memory_space<vmem>>, vector<24x3xbf16>
    %cst_8 = arith.constant dense<0.000000e+00> : vector<64x3xf32>
    %12 = tpu.matmul %10, %11, %cst_8 {dimension_numbers = #tpu.dot_dimension_numbers<[1], [0], [0], [1], [0, 0, 1, 1], [], []>} : vector<64x24xbf16>, vector<24x3xbf16>, vector<64x3xf32> -> vector<64x3xf32>
    %13 = arith.negf %12 : vector<64x3xf32>
    %14 = math.exp %13 : vector<64x3xf32>
    %cst_9 = arith.constant 1.000000e+00 : f32
    %15 = vector.broadcast %cst_9 : f32 to vector<64x3xf32>
    %16 = arith.addf %15, %14 : vector<64x3xf32>
    %17 = arith.divf %15, %16 : vector<64x3xf32>
    %18 = arith.truncf %17 : vector<64x3xf32> to vector<64x3xbf16>
    %cst_10 = arith.constant dense<0.000000e+00> : vector<3x128xf32>
    %19 = tpu.matmul %18, %5, %cst_10 {dimension_numbers = #tpu.dot_dimension_numbers<[0], [0], [1], [1], [0, 1, 1, 1], [], []>} : vector<64x3xbf16>, vector<64x128xbf16>, vector<3x128xf32> -> vector<3x128xf32>
    %c0_i32_11 = arith.constant 0 : i32
    %20 = arith.cmpi eq, %arg1, %c0_i32_11 : i32
    %21 = arith.extui %20 : i1 to i32
    %c0_i32_12 = arith.constant 0 : i32
    %22 = arith.cmpi ne, %21, %c0_i32_12 : i32
    scf.if %22 {
      %cst_19 = arith.constant 0.000000e+00 : f32
      %36 = vector.broadcast %cst_19 : f32 to vector<3x128xf32>
      %37 = arith.index_cast %arg0 : i32 to index
      %c0_20 = arith.constant 0 : index
      %c0_21 = arith.constant 0 : index
      %38 = vector.load %arg8[%37, %c0_20, %c0_21] : memref<2x3x128xf32, #tpu.memory_space<vmem>>, vector<1x3x128xf32>
      %39 = vector.shape_cast %38 : vector<1x3x128xf32> to vector<3x128xf32>
      %40 = vector.shape_cast %36 : vector<3x128xf32> to vector<1x3x128xf32>
      tpu.vector_store %arg8[%37, %c0_20, %c0_21], %40 {strides = array<i32>} : memref<2x3x128xf32, #tpu.memory_space<vmem>>, vector<1x3x128xf32>,
    } else {
    }
    %23 = arith.index_cast %arg0 : i32 to index
    %c0_13 = arith.constant 0 : index
    %c0_14 = arith.constant 0 : index
    %24 = vector.load %arg8[%23, %c0_13, %c0_14] : memref<2x3x128xf32, #tpu.memory_space<vmem>>, vector<1x3x128xf32>
    %25 = vector.shape_cast %24 : vector<1x3x128xf32> to vector<3x128xf32>
    %26 = arith.addf %25, %19 : vector<3x128xf32>
    %27 = arith.index_cast %arg0 : i32 to index
    %c0_15 = arith.constant 0 : index
    %c0_16 = arith.constant 0 : index
    %28 = vector.load %arg8[%27, %c0_15, %c0_16] : memref<2x3x128xf32, #tpu.memory_space<vmem>>, vector<1x3x128xf32>
    %29 = vector.shape_cast %28 : vector<1x3x128xf32> to vector<3x128xf32>
    %30 = vector.shape_cast %26 : vector<3x128xf32> to vector<1x3x128xf32>
    tpu.vector_store %arg8[%27, %c0_15, %c0_16], %30 {strides = array<i32>} : memref<2x3x128xf32, #tpu.memory_space<vmem>>, vector<1x3x128xf32>,
    %c1_i32 = arith.constant 1 : i32
    %31 = arith.cmpi eq, %arg0, %c1_i32 : i32
    %c0_i32_17 = arith.constant 0 : i32
    %32 = arith.cmpi eq, %arg1, %c0_i32_17 : i32
    %33 = arith.andi %31, %32 : i1
    %34 = arith.extui %33 : i1 to i32
    %c0_i32_18 = arith.constant 0 : i32
    %35 = arith.cmpi ne, %34, %c0_i32_18 : i32
    scf.if %35 {
      tpu.wait_dma2 semaphore(%arg10 : memref<!tpu.dma_semaphore, #tpu.memory_space<semaphore_mem>>) src(%arg5 : memref<384x512xbf16, #tpu.memory_space<any>>) dst(%arg9 : memref<384x512xbf16, #tpu.memory_space<vmem>>)
      %c0_19 = arith.constant 0 : index
      %c0_20 = arith.constant 0 : index
      %c0_21 = arith.constant 0 : index
      %36 = vector.load %arg8[%c0_19, %c0_20, %c0_21] : memref<2x3x128xf32, #tpu.memory_space<vmem>>, vector<2x1x128xf32>
      %37 = vector.shape_cast %36 : vector<2x1x128xf32> to vector<2x128xf32>
      %c0_22 = arith.constant 0 : index
      %c1 = arith.constant 1 : index
      %c0_23 = arith.constant 0 : index
      %38 = vector.load %arg8[%c0_22, %c1, %c0_23] : memref<2x3x128xf32, #tpu.memory_space<vmem>>, vector<2x1x128xf32>
      %39 = vector.shape_cast %38 : vector<2x1x128xf32> to vector<2x128xf32>
      %c0_24 = arith.constant 0 : index
      %c2 = arith.constant 2 : index
      %c0_25 = arith.constant 0 : index
      %40 = vector.load %arg8[%c0_24, %c2, %c0_25] : memref<2x3x128xf32, #tpu.memory_space<vmem>>, vector<2x1x128xf32>
      %41 = vector.shape_cast %40 : vector<2x1x128xf32> to vector<2x128xf32>
      %42 = tpu.concatenate %37, %39, %41 in 1 : vector<2x128xf32>, vector<2x128xf32>, vector<2x128xf32> -> vector<2x384xf32>
      %cst_26 = arith.constant 1.562500e-02 : f32
      %43 = vector.broadcast %cst_26 : f32 to vector<2x384xf32>
      %44 = arith.mulf %42, %43 : vector<2x384xf32>
      %45 = arith.truncf %44 : vector<2x384xf32> to vector<2x384xbf16>
      %c0_27 = arith.constant 0 : index
      %c0_28 = arith.constant 0 : index
      %46 = vector.load %arg9[%c0_27, %c0_28] : memref<384x512xbf16, #tpu.memory_space<vmem>>, vector<384x512xbf16>
      %cst_29 = arith.constant dense<0.000000e+00> : vector<2x512xf32>
      %47 = tpu.matmul %45, %46, %cst_29 {dimension_numbers = #tpu.dot_dimension_numbers<[1], [0], [0], [1], [0, 0, 1, 1], [], []>} : vector<2x384xbf16>, vector<384x512xbf16>, vector<2x512xf32> -> vector<2x512xf32>
      %c0_30 = arith.constant 0 : index
      %c0_31 = arith.constant 0 : index
      %48 = vector.load %arg6[%c0_30, %c0_31] : memref<1x512xf32, #tpu.memory_space<vmem>>, vector<1x512xf32>
      %49 = vector.broadcast %48 : vector<1x512xf32> to vector<2x512xf32>
      %50 = arith.addf %47, %49 : vector<2x512xf32>
      %c0_32 = arith.constant 0 : index
      %c0_33 = arith.constant 0 : index
      %51 = vector.load %arg7[%c0_32, %c0_33] : memref<2x512xf32, #tpu.memory_space<vmem>>, vector<2x512xf32>
      tpu.vector_store %arg7[%c0_32, %c0_33], %50 {strides = array<i32>} : memref<2x512xf32, #tpu.memory_space<vmem>>, vector<2x512xf32>,
    } else {
    }
    return
  }
  func.func @transform_0(%arg0: i32, %arg1: i32) -> (i32, i32) {
    %c1_i32 = arith.constant 1 : i32
    %0 = arith.muli %arg0, %c1_i32 : i32
    %1 = arith.addi %0, %arg1 : i32
    %c0_i32 = arith.constant 0 : i32
    %c0_i32_0 = arith.constant 0 : i32
    return %1, %c0_i32 : i32, i32
  }
  func.func @transform_1(%arg0: i32, %arg1: i32) -> (i32, i32) {
    %c0_i32 = arith.constant 0 : i32
    %c0_i32_0 = arith.constant 0 : i32
    %c0_i32_1 = arith.constant 0 : i32
    return %c0_i32, %c0_i32_0 : i32, i32
  }
  func.func @transform_2(%arg0: i32, %arg1: i32) -> (i32, i32) {
    %c0_i32 = arith.constant 0 : i32
    %c0_i32_0 = arith.constant 0 : i32
    %c0_i32_1 = arith.constant 0 : i32
    return %c0_i32, %c0_i32_0 : i32, i32
  }
  func.func @transform_4(%arg0: i32, %arg1: i32) -> (i32, i32) {
    %c0_i32 = arith.constant 0 : i32
    %c0_i32_0 = arith.constant 0 : i32
    %c0_i32_1 = arith.constant 0 : i32
    return %c0_i32, %c0_i32_0 : i32, i32
  }
  func.func @transform_5(%arg0: i32, %arg1: i32) -> (i32, i32) {
    %c0_i32 = arith.constant 0 : i32
    %c0_i32_0 = arith.constant 0 : i32
    %c0_i32_1 = arith.constant 0 : i32
    return %c0_i32, %c0_i32_0 : i32, i32
  }
}

</mosaic_0001>

<bundles_post_ra>
// kernel: aan_forward.1
= control target key start
LH: loop header
LB: loop body
LE: loop exit
PB: predicated region body
PF: predicated region fallthrough
CT: control target
= control target key end

     0   :  { %10 = vsyncpa [#allocation6], 0  ;;  %s2141_s18 = smov 0   ;;  %s2143_s19 = smov 0   ;;  %s2761_s0 = inlined_call_operand.vmem [shape: bf16[128,128], index: 0, kind: input, shape index: {}]   ;;  %s2762_s1 = inlined_call_operand.vmem [shape: bf16[128,24], index: 1, kind: input, shape index: {}]   ;;  %s2763_s2 = inlined_call_operand.vmem [shape: bf16[24,3], index: 2, kind: input, shape index: {}]   ;;  %s2764_s3 = inlined_call_operand.vmem [shape: bf16[384,512], index: 3, kind: input, shape index: {}]   ;;  %s2765_s4 = inlined_call_operand.vmem [shape: f32[1,512], index: 4, kind: input, shape index: {}]   ;;  %s2766_s5 = inlined_call_operand.hbm [shape: f32[2,512], index: 5, kind: output, shape index: {}]  }
   0x1   :  { %s2145_s20 = smov 0  }
   0x2 LB: > { %s1840_s21 = sadd.s32 4294967295, %s2104_s20   ;;  %s28_s22 = sadd.s32 1, %s2100_s19  ;;  %s2104_s20 = sphi %s2145_s20, %s16_s20   ;;  %s2100_s19 = sphi %s2143_s19, %s2769_s19   ;;  %s2096_s18 = sphi %s2141_s18, %s2768_s18  }
   0x3   : > { %p30_p0 = scmp.ge.s32.totalorder %s28_s22, 2  ;;  %p1843_p1 = scmp.ge.s32.totalorder %s2104_s20, 1 }
   0x4   : > { %p176_p2 = scmp.lt.s32.totalorder %s2104_s20, 3 }
   0x5   : > { %s2771_s22 = smov (%p30_p0, %s28_s22), 0 }
   0x6   : > { %p177_p3 = pnand %p1843_p1, %p176_p2 }
   0x7   : > { %s1844_s23 = sshll.u32 (!%p177_p3), %s2096_s18, 3  ;;  %p207_p4 = scmp.eq.s32.totalorder (!%p177_p3), %s2096_s18, 0 }
   0x8   : > { %180 = sbr.rel (%p177_p3) target bundleno = 1282 (0x502), region = 36  ;;  %p200_p5 = scmp.lt.s32.totalorder (!%p177_p3), %s1844_s23, 15 }
   0xf   : > { %s2773_s23 = smov (!%p200_p5, %s1844_s23), 15  ;;  %212 = sbr.rel (!%p207_p4) target bundleno = 123 (0x7b), region = 40 }
  0x10   : > { %s1845_s24 = sshll.u32 %s2773_s23, 2  ;;  %v230_v0 = vld [vmem:[%s2764_s3] sm:$0xf] (%p207_p4)  ;;  %v232_v1 = vld [vmem:[%s2764_s3 + $0x10] sm:$0xf] (%p207_p4) }
  0x11   : > { %s2167_s27 = scalar_lea.vmem %s2761_s0, %s1845_s24  ;;  %v234_v2 = vld [vmem:[%s2764_s3 + $0x4] sm:$0xf] (%p207_p4)  ;;  %231 = vst [vmem:[#allocation3] sm:$0xf] (%p207_p4), %v230_v0  ;;  %233 = vst [vmem:[#allocation3 + $0x4] sm:$0xf] (%p207_p4), %v232_v1 }
  0x12   : > { %235 = vst [vmem:[#allocation3 + $0x8] sm:$0xf] (%p207_p4), %v234_v2  ;;  %v236_v3 = vld [vmem:[%s2764_s3 + $0x14] sm:$0xf] (%p207_p4)  ;;  %v238_v4 = vld [vmem:[%s2764_s3 + $0x8] sm:$0xf] (%p207_p4) }
  0x13   : > { %v240_v5 = vld [vmem:[%s2764_s3 + $0x18] sm:$0xf] (%p207_p4)  ;;  %237 = vst [vmem:[#allocation3 + $0xc] sm:$0xf] (%p207_p4), %v236_v3  ;;  %239 = vst [vmem:[#allocation3 + $0x10] sm:$0xf] (%p207_p4), %v238_v4 }
  0x14   : > { %241 = vst [vmem:[#allocation3 + $0x14] sm:$0xf] (%p207_p4), %v240_v5  ;;  %v242_v6 = vld [vmem:[%s2764_s3 + $0xc] sm:$0xf] (%p207_p4)  ;;  %v244_v7 = vld [vmem:[%s2764_s3 + $0x1c] sm:$0xff] (%p207_p4)  }
  0x15   : > { %v248_v8 = vld [vmem:[%s2764_s3 + $0x30] sm:$0xf] (%p207_p4)  ;;  %243 = vst [vmem:[#allocation3 + $0x18] sm:$0xf] (%p207_p4), %v242_v6  ;;  %245 = vst [vmem:[#allocation3 + $0x1c] sm:$0xff] (%p207_p4), %v244_v7   ;;  %v260_v14 = vld [vmem:[%s2764_s3 + $0x3c] sm:$0xff] (%p207_p4)  }
  0x16   : > { %249 = vst [vmem:[#allocation3 + $0x24] sm:$0xf] %v248_v8  ;;  %v250_v9 = vld [vmem:[%s2764_s3 + $0x24] sm:$0xf]  ;;  %v252_v10 = vld [vmem:[%s2764_s3 + $0x34] sm:$0xf] }
  0x17   : > { %v254_v11 = vld [vmem:[%s2764_s3 + $0x28] sm:$0xf]  ;;  %251 = vst [vmem:[#allocation3 + $0x28] sm:$0xf] %v250_v9  ;;  %253 = vst [vmem:[#allocation3 + $0x2c] sm:$0xf] %v252_v10 }
  0x18   : > { %255 = vst [vmem:[#allocation3 + $0x30] sm:$0xf] %v254_v11  ;;  %v256_v12 = vld [vmem:[%s2764_s3 + $0x38] sm:$0xf]  ;;  %v258_v13 = vld [vmem:[%s2764_s3 + $0x2c] sm:$0xf] }
  0x19   : > { %257 = vst [vmem:[#allocation3 + $0x34] sm:$0xf] %v256_v12  ;;  %259 = vst [vmem:[#allocation3 + $0x38] sm:$0xf] %v258_v13  ;;  %v264_v15 = vld [vmem:[%s2764_s3 + $0x50] sm:$0xf] }
  0x1a   : > { %261 = vst [vmem:[#allocation3 + $0x3c] sm:$0xff] %v260_v14   ;;  %v266_v16 = vld [vmem:[%s2764_s3 + $0x44] sm:$0xf]  ;;  %v268_v17 = vld [vmem:[%s2764_s3 + $0x54] sm:$0xf]  ;;  %v276_v21 = vld [vmem:[%s2764_s3 + $0x5c] sm:$0xff]  }
  0x1b   : > { %265 = vst [vmem:[#allocation3 + $0x44] sm:$0xf] %v264_v15  ;;  %267 = vst [vmem:[#allocation3 + $0x48] sm:$0xf] %v266_v16  ;;  %v270_v18 = vld [vmem:[%s2764_s3 + $0x48] sm:$0xf] }
  0x1c   : > { %269 = vst [vmem:[#allocation3 + $0x4c] sm:$0xf] %v268_v17  ;;  %v272_v19 = vld [vmem:[%s2764_s3 + $0x58] sm:$0xf]  ;;  %v274_v20 = vld [vmem:[%s2764_s3 + $0x4c] sm:$0xf] }
  0x1d   : > { %271 = vst [vmem:[#allocation3 + $0x50] sm:$0xf] %v270_v18  ;;  %273 = vst [vmem:[#allocation3 + $0x54] sm:$0xf] %v272_v19  ;;  %v280_v22 = vld [vmem:[%s2764_s3 + $0x70] sm:$0xf] }
  0x1e   : > { %275 = vst [vmem:[#allocation3 + $0x58] sm:$0xf] %v274_v20  ;;  %v282_v23 = vld [vmem:[%s2764_s3 + $0x64] sm:$0xf]  ;;  %277 = vst [vmem:[#allocation3 + $0x5c] sm:$0xff] %v276_v21   ;;  %v292_v28 = vld [vmem:[%s2764_s3 + $0x7c] sm:$0xff]  }
  0x1f   : > { %281 = vst [vmem:[#allocation3 + $0x64] sm:$0xf] %v280_v22  ;;  %283 = vst [vmem:[#allocation3 + $0x68] sm:$0xf] %v282_v23  ;;  %v284_v24 = vld [vmem:[%s2764_s3 + $0x74] sm:$0xf] }
  0x20   : > { %v286_v25 = vld [vmem:[%s2764_s3 + $0x68] sm:$0xf]  ;;  %v288_v26 = vld [vmem:[%s2764_s3 + $0x78] sm:$0xf]  ;;  %285 = vst [vmem:[#allocation3 + $0x6c] sm:$0xf] %v284_v24 }
  0x21   : > { %287 = vst [vmem:[#allocation3 + $0x70] sm:$0xf] %v286_v25  ;;  %289 = vst [vmem:[#allocation3 + $0x74] sm:$0xf] %v288_v26  ;;  %v290_v27 = vld [vmem:[%s2764_s3 + $0x6c] sm:$0xf] }
  0x22   : > { %v296_v29 = vld [vmem:[%s2764_s3 + $0x90] sm:$0xf]  ;;  %291 = vst [vmem:[#allocation3 + $0x78] sm:$0xf] %v290_v27  ;;  %293 = vst [vmem:[#allocation3 + $0x7c] sm:$0xff] %v292_v28   ;;  %v308_v35 = vld [vmem:[%s2764_s3 + $0x9c] sm:$0xff]  }
  0x23   : > { %297 = vst [vmem:[#allocation3 + $0x84] sm:$0xf] %v296_v29  ;;  %v298_v30 = vld [vmem:[%s2764_s3 + $0x84] sm:$0xf]  ;;  %v300_v31 = vld [vmem:[%s2764_s3 + $0x94] sm:$0xf] }
  0x24   : > { %v302_v32 = vld [vmem:[%s2764_s3 + $0x88] sm:$0xf]  ;;  %299 = vst [vmem:[#allocation3 + $0x88] sm:$0xf] %v298_v30  ;;  %301 = vst [vmem:[#allocation3 + $0x8c] sm:$0xf] %v300_v31 }
  0x25   : > { %303 = vst [vmem:[#allocation3 + $0x90] sm:$0xf] %v302_v32  ;;  %v304_v33 = vld [vmem:[%s2764_s3 + $0x98] sm:$0xf]  ;;  %v306_v34 = vld [vmem:[%s2764_s3 + $0x8c] sm:$0xf] }
  0x26   : > { %305 = vst [vmem:[#allocation3 + $0x94] sm:$0xf] %v304_v33  ;;  %307 = vst [vmem:[#allocation3 + $0x98] sm:$0xf] %v306_v34  ;;  %v312_v36 = vld [vmem:[%s2764_s3 + $0xb0] sm:$0xf] }
  0x27   : > { %309 = vst [vmem:[#allocation3 + $0x9c] sm:$0xff] %v308_v35   ;;  %v314_v37 = vld [vmem:[%s2764_s3 + $0xa4] sm:$0xf]  ;;  %v316_v38 = vld [vmem:[%s2764_s3 + $0xb4] sm:$0xf]  ;;  %v324_v42 = vld [vmem:[%s2764_s3 + $0xbc] sm:$0xff]  }
  0x28   : > { %313 = vst [vmem:[#allocation3 + $0xa4] sm:$0xf] %v312_v36  ;;  %315 = vst [vmem:[#allocation3 + $0xa8] sm:$0xf] %v314_v37  ;;  %v318_v39 = vld [vmem:[%s2764_s3 + $0xa8] sm:$0xf] }
  0x29   : > { %317 = vst [vmem:[#allocation3 + $0xac] sm:$0xf] %v316_v38  ;;  %v320_v40 = vld [vmem:[%s2764_s3 + $0xb8] sm:$0xf]  ;;  %v322_v41 = vld [vmem:[%s2764_s3 + $0xac] sm:$0xf] }
  0x2a   : > { %319 = vst [vmem:[#allocation3 + $0xb0] sm:$0xf] %v318_v39  ;;  %321 = vst [vmem:[#allocation3 + $0xb4] sm:$0xf] %v320_v40  ;;  %v328_v43 = vld [vmem:[%s2764_s3 + $0xd0] sm:$0xf] }
  0x2b   : > { %323 = vst [vmem:[#allocation3 + $0xb8] sm:$0xf] %v322_v41  ;;  %v330_v44 = vld [vmem:[%s2764_s3 + $0xc4] sm:$0xf]  ;;  %325 = vst [vmem:[#allocation3 + $0xbc] sm:$0xff] %v324_v42   ;;  %v340_v49 = vld [vmem:[%s2764_s3 + $0xdc] sm:$0xff]  }
  0x2c   : > { %329 = vst [vmem:[#allocation3 + $0xc4] sm:$0xf] %v328_v43  ;;  %331 = vst [vmem:[#allocation3 + $0xc8] sm:$0xf] %v330_v44  ;;  %v332_v45 = vld [vmem:[%s2764_s3 + $0xd4] sm:$0xf] }
  0x2d   : > { %v334_v46 = vld [vmem:[%s2764_s3 + $0xc8] sm:$0xf]  ;;  %v336_v47 = vld [vmem:[%s2764_s3 + $0xd8] sm:$0xf]  ;;  %333 = vst [vmem:[#allocation3 + $0xcc] sm:$0xf] %v332_v45 }
  0x2e   : > { %335 = vst [vmem:[#allocation3 + $0xd0] sm:$0xf] %v334_v46  ;;  %337 = vst [vmem:[#allocation3 + $0xd4] sm:$0xf] %v336_v47  ;;  %v338_v48 = vld [vmem:[%s2764_s3 + $0xcc] sm:$0xf] }
  0x2f   : > { %v344_v50 = vld [vmem:[%s2764_s3 + $0xf0] sm:$0xf]  ;;  %339 = vst [vmem:[#allocation3 + $0xd8] sm:$0xf] %v338_v48  ;;  %341 = vst [vmem:[#allocation3 + $0xdc] sm:$0xff] %v340_v49   ;;  %v356_v56 = vld [vmem:[%s2764_s3 + $0xfc] sm:$0xff]  }
  0x30   : > { %345 = vst [vmem:[#allocation3 + $0xe4] sm:$0xf] %v344_v50  ;;  %v346_v51 = vld [vmem:[%s2764_s3 + $0xe4] sm:$0xf]  ;;  %v348_v52 = vld [vmem:[%s2764_s3 + $0xf4] sm:$0xf] }
  0x31   : > { %v350_v53 = vld [vmem:[%s2764_s3 + $0xe8] sm:$0xf]  ;;  %347 = vst [vmem:[#allocation3 + $0xe8] sm:$0xf] %v346_v51  ;;  %349 = vst [vmem:[#allocation3 + $0xec] sm:$0xf] %v348_v52 }
  0x32   : > { %351 = vst [vmem:[#allocation3 + $0xf0] sm:$0xf] %v350_v53  ;;  %v352_v54 = vld [vmem:[%s2764_s3 + $0xf8] sm:$0xf]  ;;  %v354_v55 = vld [vmem:[%s2764_s3 + $0xec] sm:$0xf] }
  0x33   : > { %353 = vst [vmem:[#allocation3 + $0xf4] sm:$0xf] %v352_v54  ;;  %355 = vst [vmem:[#allocation3 + $0xf8] sm:$0xf] %v354_v55  ;;  %v360_v57 = vld [vmem:[%s2764_s3 + $0x110] sm:$0xf] }
  0x34   : > { %357 = vst [vmem:[#allocation3 + $0xfc] sm:$0xff] %v356_v56   ;;  %v362_v58 = vld [vmem:[%s2764_s3 + $0x104] sm:$0xf]  ;;  %v364_v59 = vld [vmem:[%s2764_s3 + $0x114] sm:$0xf]  ;;  %v372_v63 = vld [vmem:[%s2764_s3 + $0x11c] sm:$0xff]  }
  0x35   : > { %361 = vst [vmem:[#allocation3 + $0x104] sm:$0xf] %v360_v57  ;;  %363 = vst [vmem:[#allocation3 + $0x108] sm:$0xf] %v362_v58  ;;  %v366_v60 = vld [vmem:[%s2764_s3 + $0x108] sm:$0xf] }
  0x36   : > { %365 = vst [vmem:[#allocation3 + $0x10c] sm:$0xf] %v364_v59  ;;  %v368_v61 = vld [vmem:[%s2764_s3 + $0x118] sm:$0xf]  ;;  %v370_v62 = vld [vmem:[%s2764_s3 + $0x10c] sm:$0xf] }
  0x37   : > { %367 = vst [vmem:[#allocation3 + $0x110] sm:$0xf] %v366_v60  ;;  %369 = vst [vmem:[#allocation3 + $0x114] sm:$0xf] %v368_v61  ;;  %v376_v0 = vld [vmem:[%s2764_s3 + $0x130] sm:$0xf] }
  0x38   : > { %371 = vst [vmem:[#allocation3 + $0x118] sm:$0xf] %v370_v62  ;;  %v378_v1 = vld [vmem:[%s2764_s3 + $0x124] sm:$0xf]  ;;  %373 = vst [vmem:[#allocation3 + $0x11c] sm:$0xff] %v372_v63   ;;  %v388_v6 = vld [vmem:[%s2764_s3 + $0x13c] sm:$0xff]  }
  0x39   : > { %377 = vst [vmem:[#allocation3 + $0x124] sm:$0xf] %v376_v0  ;;  %379 = vst [vmem:[#allocation3 + $0x128] sm:$0xf] %v378_v1  ;;  %v380_v2 = vld [vmem:[%s2764_s3 + $0x134] sm:$0xf] }
  0x3a   : > { %v382_v3 = vld [vmem:[%s2764_s3 + $0x128] sm:$0xf]  ;;  %v384_v4 = vld [vmem:[%s2764_s3 + $0x138] sm:$0xf]  ;;  %381 = vst [vmem:[#allocation3 + $0x12c] sm:$0xf] %v380_v2 }
  0x3b   : > { %383 = vst [vmem:[#allocation3 + $0x130] sm:$0xf] %v382_v3  ;;  %385 = vst [vmem:[#allocation3 + $0x134] sm:$0xf] %v384_v4  ;;  %v386_v5 = vld [vmem:[%s2764_s3 + $0x12c] sm:$0xf] }
  0x3c   : > { %v392_v7 = vld [vmem:[%s2764_s3 + $0x150] sm:$0xf]  ;;  %387 = vst [vmem:[#allocation3 + $0x138] sm:$0xf] %v386_v5  ;;  %389 = vst [vmem:[#allocation3 + $0x13c] sm:$0xff] %v388_v6   ;;  %v404_v13 = vld [vmem:[%s2764_s3 + $0x15c] sm:$0xff]  }
  0x3d   : > { %393 = vst [vmem:[#allocation3 + $0x144] sm:$0xf] %v392_v7  ;;  %v394_v8 = vld [vmem:[%s2764_s3 + $0x144] sm:$0xf]  ;;  %v396_v9 = vld [vmem:[%s2764_s3 + $0x154] sm:$0xf] }
  0x3e   : > { %v398_v10 = vld [vmem:[%s2764_s3 + $0x148] sm:$0xf]  ;;  %395 = vst [vmem:[#allocation3 + $0x148] sm:$0xf] %v394_v8  ;;  %397 = vst [vmem:[#allocation3 + $0x14c] sm:$0xf] %v396_v9 }
  0x3f   : > { %399 = vst [vmem:[#allocation3 + $0x150] sm:$0xf] %v398_v10  ;;  %v400_v11 = vld [vmem:[%s2764_s3 + $0x158] sm:$0xf]  ;;  %v402_v12 = vld [vmem:[%s2764_s3 + $0x14c] sm:$0xf] }
  0x40   : > { %401 = vst [vmem:[#allocation3 + $0x154] sm:$0xf] %v400_v11  ;;  %403 = vst [vmem:[#allocation3 + $0x158] sm:$0xf] %v402_v12  ;;  %v408_v14 = vld [vmem:[%s2764_s3 + $0x170] sm:$0xf] }
  0x41   : > { %405 = vst [vmem:[#allocation3 + $0x15c] sm:$0xff] %v404_v13   ;;  %v410_v15 = vld [vmem:[%s2764_s3 + $0x164] sm:$0xf]  ;;  %v412_v16 = vld [vmem:[%s2764_s3 + $0x174] sm:$0xf]  ;;  %v420_v20 = vld [vmem:[%s2764_s3 + $0x17c] sm:$0xff]  }
  0x42   : > { %409 = vst [vmem:[#allocation3 + $0x164] sm:$0xf] %v408_v14  ;;  %411 = vst [vmem:[#allocation3 + $0x168] sm:$0xf] %v410_v15  ;;  %v414_v17 = vld [vmem:[%s2764_s3 + $0x168] sm:$0xf] }
  0x43   : > { %413 = vst [vmem:[#allocation3 + $0x16c] sm:$0xf] %v412_v16  ;;  %v416_v18 = vld [vmem:[%s2764_s3 + $0x178] sm:$0xf]  ;;  %v418_v19 = vld [vmem:[%s2764_s3 + $0x16c] sm:$0xf] }
  0x44   : > { %415 = vst [vmem:[#allocation3 + $0x170] sm:$0xf] %v414_v17  ;;  %417 = vst [vmem:[#allocation3 + $0x174] sm:$0xf] %v416_v18  ;;  %v424_v21 = vld [vmem:[%s2764_s3 + $0x190] sm:$0xf] }
  0x45   : > { %419 = vst [vmem:[#allocation3 + $0x178] sm:$0xf] %v418_v19  ;;  %v426_v22 = vld [vmem:[%s2764_s3 + $0x184] sm:$0xf]  ;;  %421 = vst [vmem:[#allocation3 + $0x17c] sm:$0xff] %v420_v20   ;;  %v436_v27 = vld [vmem:[%s2764_s3 + $0x19c] sm:$0xff]  }
  0x46   : > { %425 = vst [vmem:[#allocation3 + $0x184] sm:$0xf] %v424_v21  ;;  %427 = vst [vmem:[#allocation3 + $0x188] sm:$0xf] %v426_v22  ;;  %v428_v23 = vld [vmem:[%s2764_s3 + $0x194] sm:$0xf] }
  0x47   : > { %v430_v24 = vld [vmem:[%s2764_s3 + $0x188] sm:$0xf]  ;;  %v432_v25 = vld [vmem:[%s2764_s3 + $0x198] sm:$0xf]  ;;  %429 = vst [vmem:[#allocation3 + $0x18c] sm:$0xf] %v428_v23 }
  0x48   : > { %431 = vst [vmem:[#allocation3 + $0x190] sm:$0xf] %v430_v24  ;;  %433 = vst [vmem:[#allocation3 + $0x194] sm:$0xf] %v432_v25  ;;  %v434_v26 = vld [vmem:[%s2764_s3 + $0x18c] sm:$0xf] }
  0x49   : > { %v440_v28 = vld [vmem:[%s2764_s3 + $0x1b0] sm:$0xf]  ;;  %435 = vst [vmem:[#allocation3 + $0x198] sm:$0xf] %v434_v26  ;;  %437 = vst [vmem:[#allocation3 + $0x19c] sm:$0xff] %v436_v27   ;;  %v452_v34 = vld [vmem:[%s2764_s3 + $0x1bc] sm:$0xff]  }
  0x4a   : > { %441 = vst [vmem:[#allocation3 + $0x1a4] sm:$0xf] %v440_v28  ;;  %v442_v29 = vld [vmem:[%s2764_s3 + $0x1a4] sm:$0xf]  ;;  %v444_v30 = vld [vmem:[%s2764_s3 + $0x1b4] sm:$0xf] }
  0x4b   : > { %v446_v31 = vld [vmem:[%s2764_s3 + $0x1a8] sm:$0xf]  ;;  %443 = vst [vmem:[#allocation3 + $0x1a8] sm:$0xf] %v442_v29  ;;  %445 = vst [vmem:[#allocation3 + $0x1ac] sm:$0xf] %v444_v30 }
  0x4c   : > { %447 = vst [vmem:[#allocation3 + $0x1b0] sm:$0xf] %v446_v31  ;;  %v448_v32 = vld [vmem:[%s2764_s3 + $0x1b8] sm:$0xf]  ;;  %v450_v33 = vld [vmem:[%s2764_s3 + $0x1ac] sm:$0xf] }
  0x4d   : > { %449 = vst [vmem:[#allocation3 + $0x1b4] sm:$0xf] %v448_v32  ;;  %451 = vst [vmem:[#allocation3 + $0x1b8] sm:$0xf] %v450_v33  ;;  %v456_v35 = vld [vmem:[%s2764_s3 + $0x1d0] sm:$0xf] }
  0x4e   : > { %453 = vst [vmem:[#allocation3 + $0x1bc] sm:$0xff] %v452_v34   ;;  %v458_v36 = vld [vmem:[%s2764_s3 + $0x1c4] sm:$0xf]  ;;  %v460_v37 = vld [vmem:[%s2764_s3 + $0x1d4] sm:$0xf]  ;;  %v468_v41 = vld [vmem:[%s2764_s3 + $0x1dc] sm:$0xff]  }
  0x4f   : > { %457 = vst [vmem:[#allocation3 + $0x1c4] sm:$0xf] %v456_v35  ;;  %459 = vst [vmem:[#allocation3 + $0x1c8] sm:$0xf] %v458_v36  ;;  %v462_v38 = vld [vmem:[%s2764_s3 + $0x1c8] sm:$0xf] }
  0x50   : > { %461 = vst [vmem:[#allocation3 + $0x1cc] sm:$0xf] %v460_v37  ;;  %v464_v39 = vld [vmem:[%s2764_s3 + $0x1d8] sm:$0xf]  ;;  %v466_v40 = vld [vmem:[%s2764_s3 + $0x1cc] sm:$0xf] }
  0x51   : > { %463 = vst [vmem:[#allocation3 + $0x1d0] sm:$0xf] %v462_v38  ;;  %465 = vst [vmem:[#allocation3 + $0x1d4] sm:$0xf] %v464_v39  ;;  %v472_v42 = vld [vmem:[%s2764_s3 + $0x1f0] sm:$0xf] }
  0x52   : > { %467 = vst [vmem:[#allocation3 + $0x1d8] sm:$0xf] %v466_v40  ;;  %v474_v43 = vld [vmem:[%s2764_s3 + $0x1e4] sm:$0xf]  ;;  %469 = vst [vmem:[#allocation3 + $0x1dc] sm:$0xff] %v468_v41   ;;  %v484_v48 = vld [vmem:[%s2764_s3 + $0x1fc] sm:$0xff]  }
  0x53   : > { %473 = vst [vmem:[#allocation3 + $0x1e4] sm:$0xf] %v472_v42  ;;  %475 = vst [vmem:[#allocation3 + $0x1e8] sm:$0xf] %v474_v43  ;;  %v476_v44 = vld [vmem:[%s2764_s3 + $0x1f4] sm:$0xf] }
  0x54   : > { %v478_v45 = vld [vmem:[%s2764_s3 + $0x1e8] sm:$0xf]  ;;  %v480_v46 = vld [vmem:[%s2764_s3 + $0x1f8] sm:$0xf]  ;;  %477 = vst [vmem:[#allocation3 + $0x1ec] sm:$0xf] %v476_v44 }
  0x55   : > { %479 = vst [vmem:[#allocation3 + $0x1f0] sm:$0xf] %v478_v45  ;;  %481 = vst [vmem:[#allocation3 + $0x1f4] sm:$0xf] %v480_v46  ;;  %v482_v47 = vld [vmem:[%s2764_s3 + $0x1ec] sm:$0xf] }
  0x56   : > { %v488_v49 = vld [vmem:[%s2764_s3 + $0x210] sm:$0xf]  ;;  %483 = vst [vmem:[#allocation3 + $0x1f8] sm:$0xf] %v482_v47  ;;  %485 = vst [vmem:[#allocation3 + $0x1fc] sm:$0xff] %v484_v48   ;;  %v500_v55 = vld [vmem:[%s2764_s3 + $0x21c] sm:$0xff]  }
  0x57   : > { %489 = vst [vmem:[#allocation3 + $0x204] sm:$0xf] %v488_v49  ;;  %v490_v50 = vld [vmem:[%s2764_s3 + $0x204] sm:$0xf]  ;;  %v492_v51 = vld [vmem:[%s2764_s3 + $0x214] sm:$0xf] }
  0x58   : > { %v494_v52 = vld [vmem:[%s2764_s3 + $0x208] sm:$0xf]  ;;  %491 = vst [vmem:[#allocation3 + $0x208] sm:$0xf] %v490_v50  ;;  %493 = vst [vmem:[#allocation3 + $0x20c] sm:$0xf] %v492_v51 }
  0x59   : > { %495 = vst [vmem:[#allocation3 + $0x210] sm:$0xf] %v494_v52  ;;  %v496_v53 = vld [vmem:[%s2764_s3 + $0x218] sm:$0xf]  ;;  %v498_v54 = vld [vmem:[%s2764_s3 + $0x20c] sm:$0xf] }
  0x5a   : > { %497 = vst [vmem:[#allocation3 + $0x214] sm:$0xf] %v496_v53  ;;  %499 = vst [vmem:[#allocation3 + $0x218] sm:$0xf] %v498_v54  ;;  %v504_v56 = vld [vmem:[%s2764_s3 + $0x230] sm:$0xf] }
  0x5b   : > { %501 = vst [vmem:[#allocation3 + $0x21c] sm:$0xff] %v500_v55   ;;  %v506_v57 = vld [vmem:[%s2764_s3 + $0x224] sm:$0xf]  ;;  %v508_v58 = vld [vmem:[%s2764_s3 + $0x234] sm:$0xf]  ;;  %v516_v62 = vld [vmem:[%s2764_s3 + $0x23c] sm:$0xff]  }
  0x5c   : > { %505 = vst [vmem:[#allocation3 + $0x224] sm:$0xf] %v504_v56  ;;  %507 = vst [vmem:[#allocation3 + $0x228] sm:$0xf] %v506_v57  ;;  %v510_v59 = vld [vmem:[%s2764_s3 + $0x228] sm:$0xf] }
  0x5d   : > { %509 = vst [vmem:[#allocation3 + $0x22c] sm:$0xf] %v508_v58  ;;  %v512_v60 = vld [vmem:[%s2764_s3 + $0x238] sm:$0xf]  ;;  %v514_v61 = vld [vmem:[%s2764_s3 + $0x22c] sm:$0xf] }
  0x5e   : > { %511 = vst [vmem:[#allocation3 + $0x230] sm:$0xf] %v510_v59  ;;  %513 = vst [vmem:[#allocation3 + $0x234] sm:$0xf] %v512_v60  ;;  %v520_v63 = vld [vmem:[%s2764_s3 + $0x250] sm:$0xf] }
  0x5f   : > { %515 = vst [vmem:[#allocation3 + $0x238] sm:$0xf] %v514_v61  ;;  %v522_v0 = vld [vmem:[%s2764_s3 + $0x244] sm:$0xf]  ;;  %517 = vst [vmem:[#allocation3 + $0x23c] sm:$0xff] %v516_v62   ;;  %v532_v5 = vld [vmem:[%s2764_s3 + $0x25c] sm:$0xff]  }
  0x60   : > { %521 = vst [vmem:[#allocation3 + $0x244] sm:$0xf] %v520_v63  ;;  %523 = vst [vmem:[#allocation3 + $0x248] sm:$0xf] %v522_v0  ;;  %v524_v1 = vld [vmem:[%s2764_s3 + $0x254] sm:$0xf] }
  0x61   : > { %v526_v2 = vld [vmem:[%s2764_s3 + $0x248] sm:$0xf]  ;;  %v528_v3 = vld [vmem:[%s2764_s3 + $0x258] sm:$0xf]  ;;  %525 = vst [vmem:[#allocation3 + $0x24c] sm:$0xf] %v524_v1 }
  0x62   : > { %527 = vst [vmem:[#allocation3 + $0x250] sm:$0xf] %v526_v2  ;;  %529 = vst [vmem:[#allocation3 + $0x254] sm:$0xf] %v528_v3  ;;  %v530_v4 = vld [vmem:[%s2764_s3 + $0x24c] sm:$0xf] }
  0x63   : > { %v536_v6 = vld [vmem:[%s2764_s3 + $0x270] sm:$0xf]  ;;  %531 = vst [vmem:[#allocation3 + $0x258] sm:$0xf] %v530_v4  ;;  %533 = vst [vmem:[#allocation3 + $0x25c] sm:$0xff] %v532_v5   ;;  %v548_v12 = vld [vmem:[%s2764_s3 + $0x27c] sm:$0xff]  }
  0x64   : > { %537 = vst [vmem:[#allocation3 + $0x264] sm:$0xf] %v536_v6  ;;  %v538_v7 = vld [vmem:[%s2764_s3 + $0x264] sm:$0xf]  ;;  %v540_v8 = vld [vmem:[%s2764_s3 + $0x274] sm:$0xf] }
  0x65   : > { %v542_v9 = vld [vmem:[%s2764_s3 + $0x268] sm:$0xf]  ;;  %539 = vst [vmem:[#allocation3 + $0x268] sm:$0xf] %v538_v7  ;;  %541 = vst [vmem:[#allocation3 + $0x26c] sm:$0xf] %v540_v8 }
  0x66   : > { %543 = vst [vmem:[#allocation3 + $0x270] sm:$0xf] %v542_v9  ;;  %v544_v10 = vld [vmem:[%s2764_s3 + $0x278] sm:$0xf]  ;;  %v546_v11 = vld [vmem:[%s2764_s3 + $0x26c] sm:$0xf] }
  0x67   : > { %545 = vst [vmem:[#allocation3 + $0x274] sm:$0xf] %v544_v10  ;;  %547 = vst [vmem:[#allocation3 + $0x278] sm:$0xf] %v546_v11  ;;  %v552_v13 = vld [vmem:[%s2764_s3 + $0x290] sm:$0xf] }
  0x68   : > { %549 = vst [vmem:[#allocation3 + $0x27c] sm:$0xff] %v548_v12   ;;  %v554_v14 = vld [vmem:[%s2764_s3 + $0x284] sm:$0xf]  ;;  %v556_v15 = vld [vmem:[%s2764_s3 + $0x294] sm:$0xf]  ;;  %v564_v19 = vld [vmem:[%s2764_s3 + $0x29c] sm:$0xff]  }
  0x69   : > { %553 = vst [vmem:[#allocation3 + $0x284] sm:$0xf] %v552_v13  ;;  %555 = vst [vmem:[#allocation3 + $0x288] sm:$0xf] %v554_v14  ;;  %v558_v16 = vld [vmem:[%s2764_s3 + $0x288] sm:$0xf] }
  0x6a   : > { %557 = vst [vmem:[#allocation3 + $0x28c] sm:$0xf] %v556_v15  ;;  %v560_v17 = vld [vmem:[%s2764_s3 + $0x298] sm:$0xf]  ;;  %v562_v18 = vld [vmem:[%s2764_s3 + $0x28c] sm:$0xf] }
  0x6b   : > { %559 = vst [vmem:[#allocation3 + $0x290] sm:$0xf] %v558_v16  ;;  %561 = vst [vmem:[#allocation3 + $0x294] sm:$0xf] %v560_v17  ;;  %v568_v20 = vld [vmem:[%s2764_s3 + $0x2b0] sm:$0xf] }
  0x6c   : > { %563 = vst [vmem:[#allocation3 + $0x298] sm:$0xf] %v562_v18  ;;  %v570_v21 = vld [vmem:[%s2764_s3 + $0x2a4] sm:$0xf]  ;;  %565 = vst [vmem:[#allocation3 + $0x29c] sm:$0xff] %v564_v19   ;;  %v580_v26 = vld [vmem:[%s2764_s3 + $0x2bc] sm:$0xff]  }
  0x6d   : > { %569 = vst [vmem:[#allocation3 + $0x2a4] sm:$0xf] %v568_v20  ;;  %571 = vst [vmem:[#allocation3 + $0x2a8] sm:$0xf] %v570_v21  ;;  %v572_v22 = vld [vmem:[%s2764_s3 + $0x2b4] sm:$0xf] }
  0x6e   : > { %v574_v23 = vld [vmem:[%s2764_s3 + $0x2a8] sm:$0xf]  ;;  %v576_v24 = vld [vmem:[%s2764_s3 + $0x2b8] sm:$0xf]  ;;  %573 = vst [vmem:[#allocation3 + $0x2ac] sm:$0xf] %v572_v22 }
  0x6f   : > { %575 = vst [vmem:[#allocation3 + $0x2b0] sm:$0xf] %v574_v23  ;;  %577 = vst [vmem:[#allocation3 + $0x2b4] sm:$0xf] %v576_v24  ;;  %v578_v25 = vld [vmem:[%s2764_s3 + $0x2ac] sm:$0xf] }
  0x70   : > { %v584_v27 = vld [vmem:[%s2764_s3 + $0x2d0] sm:$0xf]  ;;  %579 = vst [vmem:[#allocation3 + $0x2b8] sm:$0xf] %v578_v25  ;;  %581 = vst [vmem:[#allocation3 + $0x2bc] sm:$0xff] %v580_v26   ;;  %v596_v33 = vld [vmem:[%s2764_s3 + $0x2dc] sm:$0xff]  }
  0x71   : > { %585 = vst [vmem:[#allocation3 + $0x2c4] sm:$0xf] %v584_v27  ;;  %v586_v28 = vld [vmem:[%s2764_s3 + $0x2c4] sm:$0xf]  ;;  %v588_v29 = vld [vmem:[%s2764_s3 + $0x2d4] sm:$0xf] }
  0x72   : > { %v590_v30 = vld [vmem:[%s2764_s3 + $0x2c8] sm:$0xf]  ;;  %587 = vst [vmem:[#allocation3 + $0x2c8] sm:$0xf] %v586_v28  ;;  %589 = vst [vmem:[#allocation3 + $0x2cc] sm:$0xf] %v588_v29 }
  0x73   : > { %591 = vst [vmem:[#allocation3 + $0x2d0] sm:$0xf] %v590_v30  ;;  %v592_v31 = vld [vmem:[%s2764_s3 + $0x2d8] sm:$0xf]  ;;  %v594_v32 = vld [vmem:[%s2764_s3 + $0x2cc] sm:$0xf] }
  0x74   : > { %593 = vst [vmem:[#allocation3 + $0x2d4] sm:$0xf] %v592_v31  ;;  %595 = vst [vmem:[#allocation3 + $0x2d8] sm:$0xf] %v594_v32  ;;  %v600_v34 = vld [vmem:[%s2764_s3 + $0x2f0] sm:$0xf] }
  0x75   : > { %597 = vst [vmem:[#allocation3 + $0x2dc] sm:$0xff] %v596_v33   ;;  %v602_v35 = vld [vmem:[%s2764_s3 + $0x2e4] sm:$0xf]  ;;  %v604_v36 = vld [vmem:[%s2764_s3 + $0x2f4] sm:$0xf] }
  0x76   : > { %601 = vst [vmem:[#allocation3 + $0x2e4] sm:$0xf] %v600_v34  ;;  %603 = vst [vmem:[#allocation3 + $0x2e8] sm:$0xf] %v602_v35  ;;  %v606_v37 = vld [vmem:[%s2764_s3 + $0x2e8] sm:$0xf] }
  0x77   : > { %605 = vst [vmem:[#allocation3 + $0x2ec] sm:$0xf] %v604_v36  ;;  %v608_v38 = vld [vmem:[%s2764_s3 + $0x2f8] sm:$0xf]  ;;  %v610_v39 = vld [vmem:[%s2764_s3 + $0x2ec] sm:$0xf] }
  0x78   : > { %607 = vst [vmem:[#allocation3 + $0x2f0] sm:$0xf] %v606_v37  ;;  %609 = vst [vmem:[#allocation3 + $0x2f4] sm:$0xf] %v608_v38  ;;  %v612_v40 = vld [vmem:[%s2764_s3 + $0x2fc] sm:$0xf] }
  0x79   : > { %611 = vst [vmem:[#allocation3 + $0x2f8] sm:$0xf] %v610_v39  ;;  %613 = vst [vmem:[#allocation3 + $0x2fc] sm:$0xf] %v612_v40 }
  0x7a   : > { %1028 = vsyncadd [#allocation4], 12288 }
  0x7b PF: > { %v2004_v41 = vld [vmem:[%s2762_s1] sm:$0xff]   ;;  %v2005_v42 = vld [vmem:[%s2762_s1 + $0x8] sm:$0xff]   ;;  %v2006_v43 = vld [vmem:[%s2762_s1 + $0x10] sm:$0xff]   ;;  %vm1227_vm0 = vcmask 1043456   ;;  %vm1214_vm1 = vcmask 195584   ;;  %v2106_v12 = vmov 0.0  }
  0x7c   : > { %1907 = vmatprep.subr.bf16.mxu0 %v2004_v41  ;;  %v2007_v44 = vld [vmem:[%s2762_s1 + $0x18] sm:$0xff]   ;;  %v2012_v45 = vld [vmem:[%s2167_s27] sm:$0xff]   ;;  %v2009_v47 = vld [vmem:[%s2762_s1 + $0x28] sm:$0xff]   ;;  %vm2107_vm2 = vmmov 0   ;;  %vm1364_vm3 = vcmask 523264   ;;  %p1419_p6 = scmp.eq.s32.totalorder %s2096_s18, 1 }
  0x7d   : > { %1908 = vmatpush3.bf16.msra.mxu0 %v2004_v41  ;;  %1923 = vmatprep.mubr.bf16.mxu0 %v2012_v45  ;;  %v2008_v46 = vld [vmem:[%s2762_s1 + $0x20] sm:$0xff]   ;;  %v2010_v48 = vld [vmem:[%s2762_s1 + $0x30] sm:$0xff]   ;;  %v2011_v49 = vld [vmem:[%s2762_s1 + $0x38] sm:$0xff]  }
  0x7e   : > { %1909 = vmatprep.subr.bf16.mxu0 %v2005_v42  ;;  %v2013_v50 = vld [vmem:[%s2167_s27 + $0x8] sm:$0xff]   ;;  %v2014_v51 = vld [vmem:[%s2167_s27 + $0x10] sm:$0xff]   ;;  %v2015_v52 = vld [vmem:[%s2167_s27 + $0x18] sm:$0xff]   ;;  %s1874_s27 = sshll.u32 %s2096_s18, 2 }
  0x7f   : > { %v2016_v53 = vld [vmem:[%s2763_s2] sm:$0xff]   ;;  %v2017_v54 = vld [vmem:[%s2763_s2 + $0x8] ss:$0 sps:$4 sm:$0xff]   ;;  %s1412_s24 = scalar_lea.vmem [#allocation2], %s1874_s27 }
  0x80   : > { %1931 = vmatprep.subr.bf16.mxu1 %v2016_v53  ;;  %v1229_v55 = vsel %vm1227_vm0, %v2017_v54, 0  ;;  %1413 = vst [vmem:[%s1412_s24] sm:$0x7] %v2106_v12 }
  0x81   : > { %1910 = vmatpush3.bf16.msra.mxu0 %v2005_v42  ;;  %1932 = vmatpush3.bf16.msra.mxu1 %v2016_v53 }
  0x82   : > { %1911 = vmatprep.subr.bf16.mxu0 %v2006_v43  ;;  %1967 = vmatprep.subr.msk.bf16.mxu1 %vm1227_vm0, %v2017_v54 }
  0x85   : > { %1912 = vmatpush3.bf16.msra.mxu0 %v2006_v43  ;;  %1934 = vmatpush3.bf16.msra.mxu1 %v1229_v55 }
  0x86   : > { %1913 = vmatprep.subr.bf16.mxu0 %v2007_v44  ;;  %1943 = vmatprep.subr.bf16.mxu1 %v2106_v12 }
  0x89   : > { %1914 = vmatpush3.bf16.msra.mxu0 %v2007_v44 }
  0x8a   : > { %1915 = vmatprep.subr.bf16.mxu0 %v2008_v46 }
  0x8d   : > { %1916 = vmatpush3.bf16.msra.mxu0 %v2008_v46 }
  0x8e   : > { %1917 = vmatprep.subr.bf16.mxu0 %v2009_v47 }
  0x91   : > { %1918 = vmatpush3.bf16.msra.mxu0 %v2009_v47 }
  0x92   : > { %1919 = vmatprep.subr.bf16.mxu0 %v2010_v48 }
  0x95   : > { %1920 = vmatpush3.bf16.msra.mxu0 %v2010_v48 }
  0x96   : > { %1921 = vmatprep.subr.bf16.mxu0 %v2011_v49 }
  0x99   : > { %1922 = vmatpush3.bf16.msra.mxu0 %v2011_v49 }
  0x9c   : > { %1924 = vmatmul.mubr.bf16.vlgmr.msra.gmra.mrb[0].mxu0 %v2013_v50 }
  0x9d   : > { %1927 = vmatprep.mubr.bf16.mxu0 %v2014_v51 }
  0xa4   : > { %1928 = vmatmul.mubr.bf16.gmra.mrb[4].mxu0 %v2015_v52 }
 0x16f   : > { %v1925_v56 = vpop.f32.mrb[0].mxu0 }
 0x170   : > { %v1159_v57 = vpop.f32.mrb[1].mxu0  ;;  %v1192_v59 = vmax.f32 %v1925_v56, 0.0 }
 0x171   : > { %v1926_v58 = vpop.f32.mrb[2].mxu0  ;;  %v1190_v62 = vmax.f32 %v1159_v57, 0.0 }
 0x172   : > { %v1193_v60 = vmax.f32 %v1926_v58, 0.0  ;;  %v1162_v61 = vpop.f32.mrb[3].mxu0  ;;  %v1416_v58 = vld [vmem:[%s1412_s24] sm:$0x7] }
 0x173   : > { %v1191_v63 = vmax.f32 %v1162_v61, 0.0 }
 0x174   : > { %v1199_v0 = vpack.c.bf16 %v1193_v60, %v1192_v59 }
 0x175   : > { %v1198_v1 = vpack.c.bf16 %v1191_v63, %v1190_v62 }
 0x177   : > { %v1929_v2 = vpop.f32.mrb[4].mxu0  ;;  %1935 = vmatprep.mubr.msk.bf16.mxu1 %vm1214_vm1, %v1198_v1 }
 0x178   : > { %v1175_v3 = vpop.f32.mrb[5].mxu0  ;;  %1936 = vmatmul.mubr.msk.bf16.vlgmr.msra.gmra.mrb[0].mxu1 %vm1214_vm1, %v1199_v0  ;;  %v1196_v5 = vmax.f32 %v1929_v2, 0.0 }
 0x179   : > { %v1930_v4 = vpop.f32.mrb[6].mxu0  ;;  %v1194_v8 = vmax.f32 %v1175_v3, 0.0  ;;  %1944 = vmatpush3.bf16.msra.mxu1 %v2012_v45 }
 0x17a   : > { %v1197_v6 = vmax.f32 %v1930_v4, 0.0  ;;  %v1178_v7 = vpop.f32.mrb[7].mxu0  ;;  %1945 = vmatprep.subr.bf16.mxu1 %v2106_v12 }
 0x17b   : > { %v1195_v9 = vmax.f32 %v1178_v7, 0.0 }
 0x17c   : > { %v1201_v10 = vpack.c.bf16 %v1197_v6, %v1196_v5 }
 0x17d   : > { %v1200_v11 = vpack.c.bf16 %v1195_v9, %v1194_v8  ;;  %1946 = vmatpush3.bf16.msra.mxu1 %v2013_v50 }
 0x17e   : > { %1947 = vmatprep.subr.bf16.mxu1 %v2106_v12 }
 0x17f   : > { %1939 = vmatprep.mubr.msk.bf16.mxu1 %vm1214_vm1, %v1200_v11 }
 0x180   : > { %1940 = vmatmul.mubr.msk.bf16.gmra.mrb[4].mxu1 %vm1214_vm1, %v1201_v10 }
 0x181   : > { %1951 = vmatprep.mubr.msk.bf16.mxu1 %vm2107_vm2, %v2106_v12  ;;  %1948 = vmatpush3.bf16.msra.mxu1 %v2014_v51 }
 0x182   : > { %1949 = vmatprep.subr.bf16.mxu1 %v2106_v12 }
 0x185   : > { %1950 = vmatpush3.bf16.msra.mxu1 %v2015_v52 }
 0x24b   : > { %v1937_v13 = vpop.f32.mrb[0].mxu1 }
 0x24c   : > { %v1867_v14 = vmul.f32 -1.442695, %v1937_v13  ;;  %v1265_v15 = vpop.f32.mrb[1].mxu1 }
 0x24d   : > { %v1865_v16 = vmul.f32 -1.442695, %v1265_v15  ;;  %v1938_v17 = vpop.f32.mrb[2].mxu1 }
 0x24e   : > { %2018 = vpow2.f32 %v1867_v14  ;;  %v1868_v18 = vmul.f32 -1.442695, %v1938_v17  ;;  %v1268_v19 = vpop.f32.mrb[3].mxu1 }
 0x24f   : > { %2020 = vpow2.f32 %v1865_v16  ;;  %v1866_v20 = vmul.f32 -1.442695, %v1268_v19 }
 0x250   : > { %2022 = vpow2.f32 %v1868_v18 }
 0x251   : > { %2024 = vpow2.f32 %v1866_v20 }
 0x253   : > { %v1941_v21 = vpop.f32.mrb[4].mxu1 }
 0x254   : > { %v1871_v22 = vmul.f32 -1.442695, %v1941_v21  ;;  %v1281_v23 = vpop.f32.mrb[5].mxu1 }
 0x255   : > { %v1869_v24 = vmul.f32 -1.442695, %v1281_v23  ;;  %v1942_v25 = vpop.f32.mrb[6].mxu1 }
 0x256   : > { %2026 = vpow2.f32 %v1871_v22  ;;  %v1872_v26 = vmul.f32 -1.442695, %v1942_v25  ;;  %v1284_v27 = vpop.f32.mrb[7].mxu1 }
 0x257   : > { %2028 = vpow2.f32 %v1869_v24  ;;  %v1870_v28 = vmul.f32 -1.442695, %v1284_v27 }
 0x258   : > { %v2019_v29 = vpop.eup %2018  ;;  %2030 = vpow2.f32 %v1872_v26 }
 0x259   : > { %v2021_v30 = vpop.eup %2020  ;;  %v1322_v31 = vadd.f32 1.0, %v2019_v29  ;;  %2032 = vpow2.f32 %v1870_v28 }
 0x25a   : > { %v2023_v32 = vpop.eup %2022  ;;  %v1320_v33 = vadd.f32 1.0, %v2021_v30 }
 0x25b   : > { %v2025_v34 = vpop.eup %2024  ;;  %2034 = vrcp.f32 %v1322_v31  ;;  %v1323_v35 = vadd.f32 1.0, %v2023_v32 }
 0x25c   : > { %2036 = vrcp.f32 %v1320_v33  ;;  %v1321_v36 = vadd.f32 1.0, %v2025_v34 }
 0x25d   : > { %2038 = vrcp.f32 %v1323_v35 }
 0x25e   : > { %2040 = vrcp.f32 %v1321_v36 }
 0x260   : > { %v2027_v37 = vpop.eup %2026 }
 0x261   : > { %v2029_v38 = vpop.eup %2028  ;;  %v1326_v39 = vadd.f32 1.0, %v2027_v37 }
 0x262   : > { %v2031_v40 = vpop.eup %2030  ;;  %v1324_v41 = vadd.f32 1.0, %v2029_v38 }
 0x263   : > { %v2033_v42 = vpop.eup %2032  ;;  %2042 = vrcp.f32 %v1326_v39  ;;  %v1327_v43 = vadd.f32 1.0, %v2031_v40 }
 0x264   : > { %2044 = vrcp.f32 %v1324_v41  ;;  %v1325_v44 = vadd.f32 1.0, %v2033_v42 }
 0x265   : > { %v2035_v45 = vpop.eup %2034  ;;  %2046 = vrcp.f32 %v1327_v43 }
 0x266   : > { %v2037_v46 = vpop.eup %2036  ;;  %2048 = vrcp.f32 %v1325_v44 }
 0x267   : > { %v2039_v47 = vpop.eup %2038 }
 0x268   : > { %v2041_v48 = vpop.eup %2040  ;;  %v1345_v49 = vpack.c.bf16 %v2039_v47, %v2035_v45 }
 0x269   : > { %v1344_v50 = vpack.c.bf16 %v2041_v48, %v2037_v46 }
 0x26b   : > { %1348 = vxpose.xlu0.c.b16.start [1/4] (short) (narrow) %v1344_v50, 16 }
 0x26d   : > { %v2043_v51 = vpop.eup %2042 }
 0x26e   : > { %v2045_v52 = vpop.eup %2044 }
 0x26f   : > { %v2047_v53 = vpop.eup %2046  ;;  %1349 = vxpose.xlu0.c.b16.cont [2/4] (short) (narrow) %v1345_v49, 16 }
 0x270   : > { %v2049_v54 = vpop.eup %2048  ;;  %v1347_v55 = vpack.c.bf16 %v2047_v53, %v2043_v51 }
 0x271   : > { %v1346_v56 = vpack.c.bf16 %v2049_v54, %v2045_v52 }
 0x273   : > { %1350 = vxpose.xlu0.c.b16.cont [3/4] (short) (narrow) %v1346_v56, 16 }
 0x277   : > { %1351 = vxpose.xlu0.c.b16.end [4/4] (short) (narrow) %v1347_v55, 16 }
 0x2d1   : > { %v1356_v57 = vpop.trf.xlu0 }
 0x2d2   : > { %1952 = vmatmul.mubr.msk.bf16.vlgmr.msra.gmra.mrb[8].mxu1 %vm1364_vm3, %v1356_v57 }
 0x3a2   : > { %1423 = sbr.rel (!%p1419_p6) target bundleno = 1257 (0x4e9), region = 85 }
 0x3a5   : > { %v1402_v59 = vpop.f32.mrb[8].mxu1 }
 0x3a6   : > { %v1417_v60 = vadd.f32 %v1416_v58, %v1402_v59  ;;  %v1953_v61 = vpop.f32.mrb[9].mxu1 }
 0x3a7   : > { %v1405_v62 = vpop.f32.mrb[10].mxu1 }
 0x3a8   : > { %1418 = vst [vmem:[%s1412_s24] sm:$0x7] %v1417_v60  ;;  %v1954_v63 = vpop.f32.mrb[11].mxu1 }
 0x3a9   : > { %2088 = dma.done.wait [#allocation4], 12288 }
 0x3aa   : > { %2089 = vsyncadd [#allocation4], 4294955008  ;;  %v1457_v0 = vld [vmem:[#allocation3 + $0x8] sm:$0xff]  ;;  %v1459_v1 = vld [vmem:[#allocation3 + $0x18] sm:$0xff]  ;;  %vm1437_vm4 = vcmask 1041409  }
 0x3ab   : > { %v1456_v2 = vld [vmem:[#allocation3] sm:$0xff]  ;;  %1574 = vmatprep.subr.bf16.mxu0 %v1457_v0  ;;  %1656 = vmatprep.subr.bf16.mxu1 %v1459_v1  ;;  %v1458_v3 = vld [vmem:[#allocation3 + $0x10] sm:$0xff]  ;;  %v1461_v4 = vld [vmem:[#allocation3 + $0x28] sm:$0xff] }
 0x3ac   : > { %v1463_v5 = vld [vmem:[#allocation3 + $0x38] sm:$0xff]  ;;  %1575 = vmatpush1.bf16.msra.mxu0 %v1456_v2  ;;  %1657 = vmatpush1.bf16.msra.mxu1 %v1458_v3  ;;  %v1460_v6 = vld [vmem:[#allocation3 + $0x20] sm:$0xff]  ;;  %v1462_v7 = vld [vmem:[#allocation3 + $0x30] sm:$0xff] }
 0x3ad   : > { %1576 = vmatprep.subr.bf16.mxu0 %v1461_v4  ;;  %1658 = vmatprep.subr.bf16.mxu1 %v1463_v5  ;;  %v1465_v8 = vld [vmem:[#allocation3 + $0x48] sm:$0xff]  ;;  %v1467_v9 = vld [vmem:[#allocation3 + $0x58] sm:$0xff]  ;;  %v1464_v10 = vld [vmem:[#allocation3 + $0x40] sm:$0xff] }
 0x3ae   : > { %v1466_v11 = vld [vmem:[#allocation3 + $0x50] sm:$0xff]  ;;  %v1469_v12 = vld [vmem:[#allocation3 + $0x68] sm:$0xff]  ;;  %v1471_v13 = vld [vmem:[#allocation3 + $0x78] sm:$0xff] }
 0x3af   : > { %v1468_v14 = vld [vmem:[#allocation3 + $0x60] sm:$0xff]  ;;  %v1470_v15 = vld [vmem:[#allocation3 + $0x70] sm:$0xff]  ;;  %v1473_v16 = vld [vmem:[#allocation3 + $0x88] sm:$0xff] }
 0x3b0   : > { %1577 = vmatpush1.bf16.msra.mxu0 %v1460_v6  ;;  %1659 = vmatpush1.bf16.msra.mxu1 %v1462_v7  ;;  %v1475_v17 = vld [vmem:[#allocation3 + $0x98] sm:$0xff]  ;;  %v1472_v18 = vld [vmem:[#allocation3 + $0x80] sm:$0xff]  ;;  %v1474_v19 = vld [vmem:[#allocation3 + $0x90] sm:$0xff] }
 0x3b1   : > { %1578 = vmatprep.subr.bf16.mxu0 %v1465_v8  ;;  %1660 = vmatprep.subr.bf16.mxu1 %v1467_v9  ;;  %v1477_v20 = vld [vmem:[#allocation3 + $0xa8] sm:$0xff]  ;;  %v1479_v21 = vld [vmem:[#allocation3 + $0xb8] sm:$0xff]  ;;  %v1476_v22 = vld [vmem:[#allocation3 + $0xa0] sm:$0xff] }
 0x3b2   : > { %v1478_v23 = vld [vmem:[#allocation3 + $0xb0] sm:$0xff]  ;;  %v1481_v24 = vld [vmem:[#allocation3 + $0xc8] sm:$0xff]  ;;  %v1483_v25 = vld [vmem:[#allocation3 + $0xd8] sm:$0xff] }
 0x3b3   : > { %v1430_v26 = vld [vmem:[#allocation2 + $0x1] sm:$0x1]  ;;  %v1431_v27 = vld [vmem:[#allocation2 + $0x5] sm:$0x1]  ;;  %v1480_v29 = vld [vmem:[#allocation3 + $0xc0] sm:$0xff] }
 0x3b4   : > { %1579 = vmatpush1.bf16.msra.mxu0 %v1464_v10  ;;  %1661 = vmatpush1.bf16.msra.mxu1 %v1466_v11  ;;  %v1442_v28 = vrot.slane %v1431_v27, 7  ;;  %v1482_v30 = vld [vmem:[#allocation3 + $0xd0] sm:$0xff]  ;;  %v1485_v31 = vld [vmem:[#allocation3 + $0xe8] sm:$0xff]  ;;  %v1487_v32 = vld [vmem:[#allocation3 + $0xf8] sm:$0xff] }
 0x3b5   : > { %1580 = vmatprep.subr.bf16.mxu0 %v1469_v12  ;;  %1662 = vmatprep.subr.bf16.mxu1 %v1471_v13  ;;  %v1484_v35 = vld [vmem:[#allocation3 + $0xe0] sm:$0xff]  ;;  %v1486_v36 = vld [vmem:[#allocation3 + $0xf0] sm:$0xff]  ;;  %v1489_v38 = vld [vmem:[#allocation3 + $0x108] sm:$0xff] }
 0x3b6   : > { %v1443_v33 = vsel %vm1437_vm4, %v1442_v28, %v1430_v26  ;;  %v1491_v39 = vld [vmem:[#allocation3 + $0x118] sm:$0xff]  ;;  %v1488_v40 = vld [vmem:[#allocation3 + $0x100] sm:$0xff]  ;;  %v1490_v41 = vld [vmem:[#allocation3 + $0x110] sm:$0xff] }
 0x3b7   : > { %v1451_v34 = vmul.f32 0.015625, %v1443_v33  ;;  %v1493_v42 = vld [vmem:[#allocation3 + $0x128] sm:$0xff]  ;;  %v1495_v43 = vld [vmem:[#allocation3 + $0x138] sm:$0xff]  ;;  %v1492_v44 = vld [vmem:[#allocation3 + $0x120] sm:$0xff] }
 0x3b8   : > { %1581 = vmatpush1.bf16.msra.mxu0 %v1468_v14  ;;  %1663 = vmatpush1.bf16.msra.mxu1 %v1470_v15  ;;  %v1494_v45 = vld [vmem:[#allocation3 + $0x130] sm:$0xff]  ;;  %v1497_v46 = vld [vmem:[#allocation3 + $0x148] sm:$0xff]  ;;  %v1499_v47 = vld [vmem:[#allocation3 + $0x158] sm:$0xff] }
 0x3b9   : > { %1582 = vmatprep.subr.bf16.mxu0 %v1473_v16  ;;  %1664 = vmatprep.subr.bf16.mxu1 %v1475_v17  ;;  %v1454_v37 = vpack.c.bf16 %v1451_v34, %v1451_v34  ;;  %v1496_v48 = vld [vmem:[#allocation3 + $0x140] sm:$0xff]  ;;  %v1498_v49 = vld [vmem:[#allocation3 + $0x150] sm:$0xff]  ;;  %v1501_v50 = vld [vmem:[#allocation3 + $0x168] sm:$0xff] }
 0x3ba   : > { %v1503_v51 = vld [vmem:[#allocation3 + $0x178] sm:$0xff]  ;;  %v1500_v52 = vld [vmem:[#allocation3 + $0x160] sm:$0xff]  ;;  %v1502_v53 = vld [vmem:[#allocation3 + $0x170] sm:$0xff] }
 0x3bb   : > { %1606 = vmatprep.mubr.bf16.mxu0 %v1454_v37  ;;  %1688 = vmatprep.mubr.bf16.mxu1 %v1454_v37  ;;  %v1505_v54 = vld [vmem:[#allocation3 + $0x188] sm:$0xff]  ;;  %v1507_v55 = vld [vmem:[#allocation3 + $0x198] sm:$0xff]  ;;  %v1504_v56 = vld [vmem:[#allocation3 + $0x180] sm:$0xff] }
 0x3bc   : > { %1583 = vmatpush1.bf16.msra.mxu0 %v1472_v18  ;;  %1665 = vmatpush1.bf16.msra.mxu1 %v1474_v19  ;;  %v1506_v57 = vld [vmem:[#allocation3 + $0x190] sm:$0xff]  ;;  %v1429_v58 = vld [vmem:[#allocation2 + $0x4] sm:$0x1]  ;;  %v1509_v59 = vld [vmem:[#allocation3 + $0x1a8] sm:$0xff] }
 0x3bd   : > { %1584 = vmatprep.subr.bf16.mxu0 %v1477_v20  ;;  %1666 = vmatprep.subr.bf16.mxu1 %v1479_v21  ;;  %v1511_v60 = vld [vmem:[#allocation3 + $0x1b8] sm:$0xff]  ;;  %v1436_v61 = vrot.slane %v1429_v58, 7  ;;  %v1508_v62 = vld [vmem:[#allocation3 + $0x1a0] sm:$0xff]  ;;  %v1510_v63 = vld [vmem:[#allocation3 + $0x1b0] sm:$0xff] }
 0x3be   : > { %v1428_v0 = vld [vmem:[#allocation2] sm:$0x1]  ;;  %v1513_v1 = vld [vmem:[#allocation3 + $0x1c8] sm:$0xff]  ;;  %v1512_v4 = vld [vmem:[#allocation3 + $0x1c0] sm:$0xff] }
 0x3bf   : > { %v1515_v2 = vld [vmem:[#allocation3 + $0x1d8] sm:$0xff]  ;;  %v1438_v3 = vsel %vm1437_vm4, %v1436_v61, %v1428_v0  ;;  %v1514_v5 = vld [vmem:[#allocation3 + $0x1d0] sm:$0xff]  ;;  %v1517_v6 = vld [vmem:[#allocation3 + $0x1e8] sm:$0xff] }
 0x3c0   : > { %1585 = vmatpush1.bf16.msra.mxu0 %v1476_v22  ;;  %1667 = vmatpush1.bf16.msra.mxu1 %v1478_v23  ;;  %v1519_v7 = vld [vmem:[#allocation3 + $0x1f8] sm:$0xff]  ;;  %v1450_v8 = vmul.f32 0.015625, %v1438_v3  ;;  %v1516_v9 = vld [vmem:[#allocation3 + $0x1e0] sm:$0xff]  ;;  %v1518_v10 = vld [vmem:[#allocation3 + $0x1f0] sm:$0xff]  ;;  %v2108_v22 = vmov 0  }
 0x3c1   : > { %1586 = vmatprep.subr.bf16.mxu0 %v1481_v24  ;;  %1668 = vmatprep.subr.bf16.mxu1 %v1483_v25  ;;  %v1521_v11 = vld [vmem:[#allocation3 + $0x208] sm:$0xff]  ;;  %v1523_v12 = vld [vmem:[#allocation3 + $0x218] sm:$0xff]  ;;  %v1520_v14 = vld [vmem:[#allocation3 + $0x200] sm:$0xff] }
 0x3c2   : > { %v1453_v13 = vpack.c.bf16 %v1450_v8, %v1450_v8  ;;  %v1522_v15 = vld [vmem:[#allocation3 + $0x210] sm:$0xff]  ;;  %v1525_v16 = vld [vmem:[#allocation3 + $0x228] sm:$0xff]  ;;  %v1527_v17 = vld [vmem:[#allocation3 + $0x238] sm:$0xff] }
 0x3c3   : > { %v1524_v18 = vld [vmem:[#allocation3 + $0x220] sm:$0xff]  ;;  %v1526_v19 = vld [vmem:[#allocation3 + $0x230] sm:$0xff]  ;;  %v1529_v20 = vld [vmem:[#allocation3 + $0x248] sm:$0xff] }
 0x3c4   : > { %1587 = vmatpush1.bf16.msra.mxu0 %v1480_v29  ;;  %1669 = vmatpush1.bf16.msra.mxu1 %v1482_v30  ;;  %v1531_v21 = vld [vmem:[#allocation3 + $0x258] sm:$0xff]  ;;  %v1528_v23 = vld [vmem:[#allocation3 + $0x240] sm:$0xff]  ;;  %v1530_v24 = vld [vmem:[#allocation3 + $0x250] sm:$0xff] }
 0x3c5   : > { %1588 = vmatprep.subr.bf16.mxu0 %v1485_v31  ;;  %1670 = vmatprep.subr.bf16.mxu1 %v1487_v32  ;;  %v1533_v25 = vld [vmem:[#allocation3 + $0x268] sm:$0xff]  ;;  %v1535_v26 = vld [vmem:[#allocation3 + $0x278] sm:$0xff]  ;;  %v1532_v27 = vld [vmem:[#allocation3 + $0x260] sm:$0xff] }
 0x3c6   : > { %v1534_v28 = vld [vmem:[#allocation3 + $0x270] sm:$0xff]  ;;  %v1537_v29 = vld [vmem:[#allocation3 + $0x288] sm:$0xff]  ;;  %v1539_v30 = vld [vmem:[#allocation3 + $0x298] sm:$0xff] }
 0x3c7   : > { %v1433_v31 = vld [vmem:[#allocation2 + $0x6] sm:$0x1]  ;;  %v1536_v32 = vld [vmem:[#allocation3 + $0x280] sm:$0xff]  ;;  %v1538_v33 = vld [vmem:[#allocation3 + $0x290] sm:$0xff] }
 0x3c8   : > { %1589 = vmatpush1.bf16.msra.mxu0 %v1484_v35  ;;  %1671 = vmatpush1.bf16.msra.mxu1 %v1486_v36  ;;  %v1541_v34 = vld [vmem:[#allocation3 + $0x2a8] sm:$0xff]  ;;  %v1543_v35 = vld [vmem:[#allocation3 + $0x2b8] sm:$0xff]  ;;  %v1447_v36 = vrot.slane %v1433_v31, 7 }
 0x3c9   : > { %1590 = vmatprep.subr.bf16.mxu0 %v1489_v38  ;;  %1672 = vmatprep.subr.bf16.mxu1 %v1491_v39  ;;  %v1432_v37 = vld [vmem:[#allocation2 + $0x2] sm:$0x1]  ;;  %v1540_v38 = vld [vmem:[#allocation3 + $0x2a0] sm:$0xff]  ;;  %v1542_v39 = vld [vmem:[#allocation3 + $0x2b0] sm:$0xff] }
 0x3cc   : > { %1591 = vmatpush1.bf16.msra.mxu0 %v1488_v40  ;;  %1673 = vmatpush1.bf16.msra.mxu1 %v1490_v41  ;;  %v1545_v40 = vld [vmem:[#allocation3 + $0x2c8] sm:$0xff]  ;;  %v1547_v41 = vld [vmem:[#allocation3 + $0x2d8] sm:$0xff] }
 0x3cd   : > { %1592 = vmatprep.subr.bf16.mxu0 %v1493_v42  ;;  %1674 = vmatprep.subr.bf16.mxu1 %v1495_v43  ;;  %v1448_v42 = vsel %vm1437_vm4, %v1447_v36, %v1432_v37  ;;  %v1544_v43 = vld [vmem:[#allocation3 + $0x2c0] sm:$0xff] }
 0x3d0   : > { %1593 = vmatpush1.bf16.msra.mxu0 %v1492_v44  ;;  %1675 = vmatpush1.bf16.msra.mxu1 %v1494_v45  ;;  %v1546_v44 = vld [vmem:[#allocation3 + $0x2d0] sm:$0xff]  ;;  %v1549_v45 = vld [vmem:[#allocation3 + $0x2e8] sm:$0xff] }
 0x3d1   : > { %1594 = vmatprep.subr.bf16.mxu0 %v1497_v46  ;;  %1676 = vmatprep.subr.bf16.mxu1 %v1499_v47  ;;  %v1551_v46 = vld [vmem:[#allocation3 + $0x2f8] sm:$0xff]  ;;  %v1452_v47 = vmul.f32 0.015625, %v1448_v42 }
 0x3d4   : > { %1595 = vmatpush1.bf16.msra.mxu0 %v1496_v48  ;;  %1677 = vmatpush1.bf16.msra.mxu1 %v1498_v49  ;;  %v1548_v48 = vld [vmem:[#allocation3 + $0x2e0] sm:$0xff]  ;;  %v1550_v49 = vld [vmem:[#allocation3 + $0x2f0] sm:$0xff] }
 0x3d5   : > { %1596 = vmatprep.subr.bf16.mxu0 %v1501_v50  ;;  %1678 = vmatprep.subr.bf16.mxu1 %v1503_v51  ;;  %v1455_v50 = vpack.c.bf16 %v1452_v47, %v1452_v47  ;;  %v1554_v51 = vlaneseq }
 0x3d8   : > { %1597 = vmatpush1.bf16.msra.mxu0 %v1500_v52  ;;  %1679 = vmatpush1.bf16.msra.mxu1 %v1502_v53  ;;  %v1555_v52 = vshrl.u32 %v1554_v51, 7 }
 0x3d9   : > { %1598 = vmatprep.subr.bf16.mxu0 %v1505_v54  ;;  %1680 = vmatprep.subr.bf16.mxu1 %v1507_v55  ;;  %v1552_v55 = vld [vmem:[%s2765_s4] sm:$0xf] }
 0x3da   : > { %v1556_v53 = vsub.s32 0, %v1555_v52  ;;  %v1564_v54 = vsub.s32 2, %v1555_v52 }
 0x3dc   : > { %1599 = vmatpush1.bf16.msra.mxu0 %v1504_v56  ;;  %1681 = vmatpush1.bf16.msra.mxu1 %v1506_v57  ;;  %v1560_v56 = vsub.s32 1, %v1555_v52  ;;  %v2109_v57 = vmov 1983009808   ;;  %v1565_v61 = vrot.slane %v1552_v55, %v1564_v54 }
 0x3dd   : > { %1600 = vmatprep.subr.bf16.mxu0 %v1509_v59  ;;  %1682 = vmatprep.subr.bf16.mxu1 %v1511_v60  ;;  %v1745_v58 = vunpack.c.l.s4 %v2109_v57  ;;  %v1568_v59 = vsub.s32 3, %v1555_v52  ;;  %v1557_v60 = vrot.slane %v1552_v55, %v1556_v53 }
 0x3df   : > { %v1569_v0 = vrot.slane %v1552_v55, %v1568_v59 }
 0x3e0   : > { %1601 = vmatpush1.bf16.msra.mxu0 %v1508_v62  ;;  %1683 = vmatpush1.bf16.msra.mxu1 %v1510_v63  ;;  %v1561_v62 = vrot.slane %v1552_v55, %v1560_v56  ;;  %v1746_v63 = vunpack.c.0.s8 %v1745_v58 }
 0x3e1   : > { %1602 = vmatprep.subr.bf16.mxu0 %v1513_v1  ;;  %1684 = vmatprep.subr.bf16.mxu1 %v1515_v2 }
 0x3e2   : > { %v1749_v8 = vsub.s32 %v1746_v63, %v1555_v52 }
 0x3e4   : > { %1603 = vmatpush1.bf16.msra.mxu0 %v1512_v4  ;;  %1685 = vmatpush1.bf16.msra.mxu1 %v1514_v5 }
 0x3e5   : > { %1604 = vmatprep.subr.bf16.mxu0 %v1517_v6  ;;  %1686 = vmatprep.subr.bf16.mxu1 %v1519_v7 }
 0x3e8   : > { %1605 = vmatpush1.bf16.msra.mxu0 %v1516_v9  ;;  %1687 = vmatpush1.bf16.msra.mxu1 %v1518_v10 }
 0x3e9   : > { %1615 = vmatprep.subr.bf16.mxu0 %v1521_v11  ;;  %1697 = vmatprep.subr.bf16.mxu1 %v1523_v12 }
 0x3eb   : > { %1607 = vmatmul.mubr.bf16.vlgmr.msra.gmra.mrb[0].mxu0 %v1453_v13  ;;  %1689 = vmatmul.mubr.bf16.vlgmr.msra.gmra.mrb[0].mxu1 %v1453_v13 }
 0x3ec   : > { %1616 = vmatpush1.bf16.msra.mxu0 %v1520_v14  ;;  %1698 = vmatpush1.bf16.msra.mxu1 %v1522_v15 }
 0x3ed   : > { %1617 = vmatprep.subr.bf16.mxu0 %v1525_v16  ;;  %1699 = vmatprep.subr.bf16.mxu1 %v1527_v17 }
 0x3ee   : > { %1647 = vmatprep.mubr.bf16.mxu0 %v2108_v22  ;;  %1729 = vmatprep.mubr.bf16.mxu1 %v2108_v22 }
 0x3f0   : > { %1618 = vmatpush1.bf16.msra.mxu0 %v1524_v18  ;;  %1700 = vmatpush1.bf16.msra.mxu1 %v1526_v19 }
 0x3f1   : > { %1619 = vmatprep.subr.bf16.mxu0 %v1529_v20  ;;  %1701 = vmatprep.subr.bf16.mxu1 %v1531_v21 }
 0x3f4   : > { %1620 = vmatpush1.bf16.msra.mxu0 %v1528_v23  ;;  %1702 = vmatpush1.bf16.msra.mxu1 %v1530_v24 }
 0x3f5   : > { %1621 = vmatprep.subr.bf16.mxu0 %v1533_v25  ;;  %1703 = vmatprep.subr.bf16.mxu1 %v1535_v26 }
 0x3f8   : > { %1622 = vmatpush1.bf16.msra.mxu0 %v1532_v27  ;;  %1704 = vmatpush1.bf16.msra.mxu1 %v1534_v28 }
 0x3f9   : > { %1623 = vmatprep.subr.bf16.mxu0 %v1537_v29  ;;  %1705 = vmatprep.subr.bf16.mxu1 %v1539_v30 }
 0x3fc   : > { %1624 = vmatpush1.bf16.msra.mxu0 %v1536_v32  ;;  %1706 = vmatpush1.bf16.msra.mxu1 %v1538_v33 }
 0x3fd   : > { %1625 = vmatprep.subr.bf16.mxu0 %v1541_v34  ;;  %1707 = vmatprep.subr.bf16.mxu1 %v1543_v35 }
 0x400   : > { %1626 = vmatpush1.bf16.msra.mxu0 %v1540_v38  ;;  %1708 = vmatpush1.bf16.msra.mxu1 %v1542_v39 }
 0x401   : > { %1627 = vmatprep.subr.bf16.mxu0 %v1545_v40  ;;  %1709 = vmatprep.subr.bf16.mxu1 %v1547_v41 }
 0x404   : > { %1628 = vmatpush1.bf16.msra.mxu0 %v1544_v43  ;;  %1710 = vmatpush1.bf16.msra.mxu1 %v1546_v44 }
 0x405   : > { %1629 = vmatprep.subr.bf16.mxu0 %v1549_v45  ;;  %1711 = vmatprep.subr.bf16.mxu1 %v1551_v46 }
 0x408   : > { %1630 = vmatpush1.bf16.msra.mxu0 %v1548_v48  ;;  %1712 = vmatpush1.bf16.msra.mxu1 %v1550_v49 }
 0x40b   : > { %1648 = vmatmul.mubr.bf16.vlgmr.msra.gmra.mrb[0].mxu0 %v1455_v50  ;;  %1730 = vmatmul.mubr.bf16.vlgmr.msra.gmra.mrb[0].mxu1 %v1455_v50 }
 0x4de   : > { %v1649_v1 = vpop.f32.mrb[0].mxu0  ;;  %v1731_v2 = vpop.f32.mrb[0].mxu1 }
 0x4df   : > { %v1955_v3 = vadd.f32 %v1649_v1, %v1557_v60  ;;  %v1957_v4 = vadd.f32 %v1731_v2, %v1565_v61  ;;  %v1651_v5 = vpop.f32.mrb[1].mxu0  ;;  %v1733_v6 = vpop.f32.mrb[1].mxu1 }
 0x4e0   : > { %v1956_v7 = vadd.f32 %v1651_v5, %v1561_v62  ;;  %v1958_v9 = vadd.f32 %v1733_v6, %v1569_v0  ;;  %v1653_v10 = vpop.f32.mrb[2].mxu0  ;;  %v1735_v11 = vpop.f32.mrb[2].mxu1 }
 0x4e1   : > { %v1654_v12 = vpop.f32.mrb[3].mxu0  ;;  %v1736_v13 = vpop.f32.mrb[3].mxu1 }
 0x4e2   : > { %v1742_v14 = vcombine.low %v1955_v3, %v1956_v7  ;;  %v1743_v15 = vcombine.low %v1957_v4, %v1958_v9 }
 0x4e4   : > { %v1750_v16 = vrot.slane %v1742_v14, %v1749_v8  ;;  %v1757_v17 = vrot.slane %v1743_v15, %v1749_v8 }
 0x4e6   : > { %v1758_v18 = vcombine.low %v1750_v16, %v1757_v17 }
 0x4e8   : > { %1760 = vst [vmem:[#allocation5] sm:$0xff] %v1758_v18 }
 0x4e9 PF: > { %p2726_p7 = scmp.eq.s32.totalorder %s1840_s21, 1  ;;  %s2110_s28 = smov [#allocation5]  }
 0x4ea   : > { %s1768_s29 = sshll.u32 %s2110_s28, 4  ;;  %s1769_s29 = int_to_ptr.vmem [resolvable:$true] %s1768_s29 }
 0x4eb   : > { %s2050_s30 = scalar_lea.vmem %s1769_s29, 128  ;;  %p2057_p11 = scmp.lt.s32.totalorder %s1769_s29, %s1769_s29 }
 0x4ec   : > { %p2051_p8 = scmp.ne.s32.totalorder %s1769_s29, %s2050_s30  ;;  %p2058_p12 = scmp.lt.s32.totalorder %s2050_s30, %s2050_s30 }
 0x4ee   : > { %p2052_p9 = pnand %p2051_p8, %p2726_p7  ;;  %p2059_p13 = por %p2058_p12, %p2057_p11 }
 0x4f0   : > { %p2053_p10 = pneg %p2052_p9 }
 0x4f2   : > { %p2060_p0 = pnand %p2059_p13, %p2053_p10 }
 0x4f4   : > { %2063 = shalt.err (!%p2060_p0)
}
 0x4f5   : > { %s2064_s21 = scalar_lea.hbm %s2766_s5, 128 }
 0x4f6   : > { %p2065_p1 = scmp.ne.s32.totalorder %s2766_s5, %s2064_s21  ;;  %p2070_p4 = scmp.lt.u32.totalorder %s2064_s21, %s2766_s5 }
 0x4f8   : > { %p2066_p2 = pnand %p2065_p1, %p2726_p7 }
 0x4fa   : > { %p2067_p3 = pneg %p2066_p2 }
 0x4fc   : > { %p2072_p5 = pnand %p2070_p4, %p2067_p3 }
 0x4fe   : > { %2075 = shalt.err (!%p2072_p5)
}
 0x4ff   : > { %1969 = dma.vmem_to_hbm [thread:$0]  (%p2726_p7), %s1769_s29, 128, %s2766_s5, [#allocation6]  }
 0x500   : > { %2091 = dma.done.wait (%p2726_p7), [#allocation6], 128  }
 0x501   : > { %2093 = vsyncadd (%p2726_p7), [#allocation6], 4294967168 }
 0x502 PF: > { %s16_s20 = sadd.s32 1, %s2104_s20   ;;  %s2768_s18 = smov %s2100_s19 }
 0x503   : > { %p13_p6 = scmp.ge.s32.totalorder %s16_s20, 4   ;;  %s2769_s19 = smov %s2771_s22 }
 0x505   :  { %15 = sbr.rel (!%p13_p6) target bundleno = 2 (0x2), region = 128 }
 0x50c   :  { %1781 = vsyncpa [#allocation6], 1 }
 0x50d   :  { %1783 = vsyncpa [#allocation6 + $0x1], 1 }
 0x50e   :  { %1784 = vsyncmov [#allocation4] }
 0x511   :  { %s1785_s14 = vpop.sfrf %1784 }
 0x512   :  { %p1881_p8 = scmp.ne.s32.totalorder %s1785_s14, 0 }
 0x514   :  { %1789 = shalt.err (%p1881_p8)  }

</bundles_post_ra>
